<compile_context>
chip_gen: v6e
topology: v6e:2x2x1
jax: 0.10.0
libtpu: 0.0.40
codegen_flags: <defaults>
</compile_context>

<pallas_src>
import math

import numpy as np
import jax
import jax.numpy as jnp
from jax import lax
from jax.experimental import pallas as pl
from jax.experimental.pallas import tpu as pltpu


_PAD = 3          # Conv2d(..., kernel_size=3, padding=3)
_KS = 3
_COUT = 32        # channels of every conv block
_HIDDEN = 16      # get_mlp(2, [16, out_channels]) hidden width
_BATCH_TILE = 128 # batch rows per grid step (sublane axis of every matmul)


# ---------------------------------------------------------------------------
# Static geometry: for each block, the interior of the pre-pool map and a
# pooling "plan" — for every 2x2 ceil-mode pooled cell, the interior indices
# it covers and whether it also touches the constant border.
# ---------------------------------------------------------------------------
def _layer_geometry(in_hw):
    pre = in_hw + 2 * _PAD - (_KS - 1)           # valid-conv output size
    lo = _PAD - (_KS - 1)                        # first interior row/col
    hi = _PAD + in_hw - 1                        # last interior row/col
    iw = hi - lo + 1                             # interior width
    pooled = -(-pre // 2)                        # MaxPool2d(2,2, ceil_mode)
    plan = []
    for a in range(pooled):
        for b in range(pooled):
            idxs, border = [], False
            for r in (2 * a, 2 * a + 1):
                for c in (2 * b, 2 * b + 1):
                    if r >= pre or c >= pre:     # ceil_mode: window clipped
                        continue
                    if lo <= r <= hi and lo <= c <= hi:
                        idxs.append((r - lo) * iw + (c - lo))
                    else:
                        border = True            # cell value == ReLU(bias)
            plan.append((tuple(idxs), border))
    return dict(in_hw=in_hw, pre=pre, lo=lo, iw=iw, pooled=pooled, plan=plan)


def _network_geometry():
    geos, in_hw = [], 1
    for _ in range(3):
        g = _layer_geometry(in_hw)
        geos.append(g)
        in_hw = g["pooled"]
    return tuple(geos)


_GEOM = _network_geometry()            # interiors: 3x3, 5x5, 6x6; pooled: 3,4,4
_GAP_N = _GEOM[-1]["pooled"] ** 2      # global-average-pool element count (16)


# ---------------------------------------------------------------------------
# Fused kernel: 3 conv blocks + GAP + MLP for one batch tile.
# ---------------------------------------------------------------------------
def _fused_sp2d_kernel(x_ref,
                       w1_ref, bc1_ref, rb1_ref,
                       w2_ref, bc2_ref, rb2_ref,
                       w3_ref, bc3_ref, rb3_ref,
                       mw1_ref, mb1_ref, mw2_ref, mb2_ref,
                       o_ref):
    f32 = jnp.float32
    bt = x_ref.shape[0]                # batch-tile rows (sublane axis)

    def conv_block(act, w_ref, bc_ref, rb_ref, plan):
        # One lane-dense matmul: (bt, K) @ (K, n_interior*32).  BN is folded
        # into the weights; constant pooled cells of the previous layer and
        # the conv bias are pre-folded into the per-position bias row.
        y = jnp.maximum(
            jnp.dot(act, w_ref[...], preferred_element_type=f32) + bc_ref[...],
            0.0)
        rb = jnp.broadcast_to(rb_ref[...], (bt, _COUT))   # hoisted broadcast
        pooled = []
        for idxs, touches_border in plan:
            if not idxs:
                # purely-constant pooled cell: already folded into the NEXT
                # layer's bias host-side, nothing to materialise here.
                continue
            v = y[:, idxs[0] * _COUT:(idxs[0] + 1) * _COUT]
            for k in idxs[1:]:
                v = jnp.maximum(v, y[:, k * _COUT:(k + 1) * _COUT])
            if touches_border:
                v = jnp.maximum(v, rb)
            pooled.append(v)
        return pooled

    x1 = jnp.concatenate(
        conv_block(x_ref[...], w1_ref, bc1_ref, rb1_ref, _GEOM[0]["plan"]),
        axis=1)                                            # (bt, 4*32)
    x2 = jnp.concatenate(
        conv_block(x1, w2_ref, bc2_ref, rb2_ref, _GEOM[1]["plan"]),
        axis=1)                                            # (bt, 9*32)
    p3 = conv_block(x2, w3_ref, bc3_ref, rb3_ref, _GEOM[2]["plan"])

    feat = p3[0]
    for v in p3[1:]:
        feat = feat + v                                    # (bt, 32); 1/16 in mw1

    h = jnp.maximum(
        jnp.dot(feat, mw1_ref[...], preferred_element_type=f32) + mb1_ref[...],
        0.0)
    o_ref[...] = (jnp.dot(h, mw2_ref[...], preferred_element_type=f32)
                  + mb2_ref[...])


# ---------------------------------------------------------------------------
# Wrapper: one pallas_call, grid over batch tiles.
# ---------------------------------------------------------------------------
def _round_up(n, m):
    return -(-n // m) * m


def _fused_forward(x_ct, kp, batch_tile=_BATCH_TILE):
    """x_ct: (B, Cin) centre-pixel spectra -> (B, out_channels) logits."""
    B, cin = x_ct.shape
    out_ch = kp["mw2"].shape[1]
    bt = min(batch_tile, _round_up(B, 8))      # sublane-aligned batch tile
    b_pad = _round_up(B, bt)
    if b_pad != B:
        x_ct = jnp.pad(x_ct, ((0, b_pad - B), (0, 0)))
    n_tiles = b_pad // bt

    def full(shape):
        return pl.BlockSpec(shape, lambda b: (0,) * len(shape))

    weights = [kp["w1"], kp["bc1"], kp["rb1"],
               kp["w2"], kp["bc2"], kp["rb2"],
               kp["w3"], kp["bc3"], kp["rb3"],
               kp["mw1"], kp["mb1"], kp["mw2"], kp["mb2"]]
    in_specs = ([pl.BlockSpec((bt, cin), lambda b: (b, 0))]
                + [full(w.shape) for w in weights])

    out = pl.pallas_call(
        _fused_sp2d_kernel,
        out_shape=jax.ShapeDtypeStruct((b_pad, out_ch), jnp.float32),
        grid=(n_tiles,),
        in_specs=in_specs,
        out_specs=pl.BlockSpec((bt, out_ch), lambda b: (b, 0)),
        compiler_params=pltpu.CompilerParams(
            dimension_semantics=("parallel",),   # >=2 tiles -> both v7x TCs busy
            vmem_limit_bytes=32 * 1024 * 1024,
        ),
    )(x_ct, *weights)
    return out[:B]


# ---------------------------------------------------------------------------
# Parameters (deterministic PyTorch-default-style init) + host-side folding.
# ---------------------------------------------------------------------------
def init_params(key, input_channels, out_channels):
    def conv_init(k, cin, cout):
        kw, kb = jax.random.split(k)
        bound = 1.0 / math.sqrt(cin * 9)
        w = jax.random.uniform(kw, (3, 3, cin, cout), jnp.float32, -bound, bound)
        b = jax.random.uniform(kb, (cout,), jnp.float32, -bound, bound)
        return w, b

    def linear_init(k, cin, cout):
        kw, kb = jax.random.split(k)
        bound = 1.0 / math.sqrt(cin)
        w = jax.random.uniform(kw, (cin, cout), jnp.float32, -bound, bound)
        b = jax.random.uniform(kb, (cout,), jnp.float32, -bound, bound)
        return w, b

    keys = jax.random.split(key, 5)
    params = {}
    cins = (input_channels, _COUT, _COUT)
    for i, cin in enumerate(cins):
        w, b = conv_init(keys[i], cin, _COUT)
        # TODO(synk): BatchNorm2d is applied in inference mode with default
        # running stats / affine parameters (gamma=1, beta=0, mean=0, var=1).
        params[f"conv{i + 1}"] = dict(
            w=w, b=b,
            gamma=jnp.ones((_COUT,), jnp.float32),
            beta=jnp.zeros((_COUT,), jnp.float32),
            mean=jnp.zeros((_COUT,), jnp.float32),
            var=jnp.ones((_COUT,), jnp.float32))
    # TODO(synk): get_mlp(2, [16, out_channels]) interpreted as
    # Linear(32 -> 16) -> ReLU -> Linear(16 -> out_channels).
    w1, b1 = linear_init(keys[3], _COUT, _HIDDEN)
    w2, b2 = linear_init(keys[4], _HIDDEN, out_channels)
    params["mlp"] = dict(w1=w1, b1=b1, w2=w2, b2=b2)
    return params


def build_kernel_params(params, eps=1e-5):
    """One-off host-side folding: BN -> conv weights/bias, conv -> dense
    position-expanded matrices, constant pooled cells -> next-layer bias,
    global-average-pool 1/16 -> first MLP weight."""
    kp = {}
    comp_mask = [True]          # layer-1 "input" = the single centre pixel
    rb_prev = None
    for li in (1, 2, 3):
        p = params[f"conv{li}"]
        scale = np.asarray(p["gamma"]) / np.sqrt(np.asarray(p["var"]) + eps)
        w = (np.asarray(p["w"]) * scale).astype(np.float32)       # (3,3,Cin,Cout)
        b = ((np.asarray(p["b"]) - np.asarray(p["mean"])) * scale
             + np.asarray(p["beta"])).astype(np.float32)          # (Cout,)
        g = _GEOM[li - 1]
        in_hw, lo, iw = g["in_hw"], g["lo"], g["iw"]
        cin, cout = w.shape[2], w.shape[3]
        n_comp = int(sum(comp_mask))
        wbig = np.zeros((n_comp * cin, iw * iw * cout), np.float32)
        bias = np.tile(b, iw * iw).reshape(1, -1).astype(np.float32)
        blk = 0
        for r in range(in_hw):
            for c in range(in_hw):
                is_comp = bool(comp_mask[r * in_hw + c])
                for oi in range(iw):
                    for oj in range(iw):
                        dh = (_PAD + r) - (lo + oi)
                        dw = (_PAD + c) - (lo + oj)
                        if not (0 <= dh < _KS and 0 <= dw < _KS):
                            continue
                        col = (oi * iw + oj) * cout
                        if is_comp:
                            wbig[blk * cin:(blk + 1) * cin,
                                 col:col + cout] = w[dh, dw]
                        else:
                            bias[0, col:col + cout] += rb_prev @ w[dh, dw]
                if is_comp:
                    blk += 1
        rb = np.maximum(b, 0.0).astype(np.float32)
        kp[f"w{li}"] = jnp.asarray(wbig)
        kp[f"bc{li}"] = jnp.asarray(bias)
        kp[f"rb{li}"] = jnp.asarray(rb.reshape(1, cout))
        comp_mask = [bool(idxs) for idxs, _ in g["plan"]]
        rb_prev = rb

    m = params["mlp"]
    mw1 = np.asarray(m["w1"], np.float32)
    mb1 = np.asarray(m["b1"], np.float32)
    # purely-constant pooled cells of the last layer (none for this geometry,
    # handled generically) contribute a constant to the GAP mean:
    n_const_final = sum(1 for c in comp_mask if not c)
    if n_const_final:
        mb1 = mb1 + (rb_prev * (n_const_final / _GAP_N)) @ mw1
    kp["mw1"] = jnp.asarray(mw1 / _GAP_N)
    kp["mb1"] = jnp.asarray(mb1.reshape(1, -1))
    kp["mw2"] = jnp.asarray(np.asarray(m["w2"], np.float32))
    kp["mb2"] = jnp.asarray(np.asarray(m["b2"], np.float32).reshape(1, -1))
    return kp


# ---------------------------------------------------------------------------
# Module forward + pure-JAX reference.
# ---------------------------------------------------------------------------
def center_pixel(x_nchw):
    # TODO(synk): center_pixel helper is not defined in the provided source;
    # standard definition used: spectrum of the central pixel of the patch.
    _, _, H, W = x_nchw.shape
    return x_nchw[:, :, H // 2, W // 2]                        # (B, C)


@jax.jit
def sp_2d_3layer_forward(kernel_params, x_nchw):
    # TODO(synk): compute_local_feature / sideout2d are not defined in the
    # provided source; interpreted as a 1x1 spatial lift of the centre
    # spectrum and global-average-pool + MLP respectively.
    pt_ct = center_pixel(x_nchw)
    out = _fused_forward(pt_ct, kernel_params)
    return ([out], [])


def _reference_forward(params, x_nchw, eps=1e-5):
    """Pure-JAX (XLA) reference of the same forward pass, for validation."""
    pt_ct = center_pixel(x_nchw)
    h = pt_ct[:, None, None, :]                                # NHWC (B,1,1,C)
    for i in (1, 2, 3):
        p = params[f"conv{i}"]
        y = lax.conv_general_dilated(
            h, p["w"], window_strides=(1, 1),
            padding=((_PAD, _PAD), (_PAD, _PAD)),
            dimension_numbers=("NHWC", "HWIO", "NHWC"))
        scale = p["gamma"] / jnp.sqrt(p["var"] + eps)
        y = jnp.maximum((y + p["b"] - p["mean"]) * scale + p["beta"], 0.0)
        h = lax.reduce_window(
            y, -jnp.inf, lax.max,
            window_dimensions=(1, 2, 2, 1), window_strides=(1, 2, 2, 1),
            padding=[(0, 0), (0, y.shape[1] % 2), (0, y.shape[2] % 2), (0, 0)])
    feat = jnp.mean(h, axis=(1, 2))
    m = params["mlp"]
    hid = jnp.maximum(feat @ m["w1"] + m["b1"], 0.0)
    return hid @ m["w2"] + m["b2"]


if __name__ == "__main__":
    key = jax.random.PRNGKey(0)
    kx, kparam = jax.random.split(key)
    input_channels, out_channels = 16, 10
    # hyperspectral patch cube: batch=2, 16 spectral bands, 9x9 spatial patch
    x = jax.random.normal(kx, (2, input_channels, 9, 9), dtype=jnp.float32)
    params = init_params(kparam, input_channels, out_channels)
    kernel_params = build_kernel_params(params)   # one-off host-side folding

    outs, _ = sp_2d_3layer_forward(kernel_params, x)
    out = jax.block_until_ready(outs[0])
    assert out.shape == (2, out_channels)
    assert bool(jnp.all(jnp.isfinite(out)))

    ref = _reference_forward(params, x)
    assert bool(jnp.allclose(out, ref, atol=5e-4, rtol=5e-4)), (
        "Pallas output does not match the XLA reference")
    print("KERNEL_OK")
</pallas_src>

<mosaic_0001>
module attributes {stable_mosaic.version = 11 : i64} {
  func.func @_fused_sp2d_kernel(%arg0: i32, %arg1: memref<8x16xf32, #tpu.memory_space<vmem>>, %arg2: memref<16x288xf32, #tpu.memory_space<vmem>>, %arg3: memref<1x288xf32, #tpu.memory_space<vmem>>, %arg4: memref<1x32xf32, #tpu.memory_space<vmem>>, %arg5: memref<128x800xf32, #tpu.memory_space<vmem>>, %arg6: memref<1x800xf32, #tpu.memory_space<vmem>>, %arg7: memref<1x32xf32, #tpu.memory_space<vmem>>, %arg8: memref<288x1152xf32, #tpu.memory_space<vmem>>, %arg9: memref<1x1152xf32, #tpu.memory_space<vmem>>, %arg10: memref<1x32xf32, #tpu.memory_space<vmem>>, %arg11: memref<32x16xf32, #tpu.memory_space<vmem>>, %arg12: memref<1x16xf32, #tpu.memory_space<vmem>>, %arg13: memref<16x10xf32, #tpu.memory_space<vmem>>, %arg14: memref<1x10xf32, #tpu.memory_space<vmem>>, %arg15: memref<8x10xf32, #tpu.memory_space<vmem>>) attributes {dimension_semantics = [#tpu.dimension_semantics<parallel>], iteration_bounds = array<i64: 1>, scalar_prefetch = 0 : i64, scratch_operands = 0 : i64, tpu.core_type = #tpu.core_type<tc>, window_params = [{transform_indices = @transform_0, window_bounds = array<i64: 8, 16>}, {pipeline_mode = #tpu.pipeline_mode<synchronous>, transform_indices = @transform_1, window_bounds = array<i64: 16, 288>}, {pipeline_mode = #tpu.pipeline_mode<synchronous>, transform_indices = @transform_2, window_bounds = array<i64: 1, 288>}, {pipeline_mode = #tpu.pipeline_mode<synchronous>, transform_indices = @transform_3, window_bounds = array<i64: 1, 32>}, {pipeline_mode = #tpu.pipeline_mode<synchronous>, transform_indices = @transform_4, window_bounds = array<i64: 128, 800>}, {pipeline_mode = #tpu.pipeline_mode<synchronous>, transform_indices = @transform_5, window_bounds = array<i64: 1, 800>}, {pipeline_mode = #tpu.pipeline_mode<synchronous>, transform_indices = @transform_6, window_bounds = array<i64: 1, 32>}, {pipeline_mode = #tpu.pipeline_mode<synchronous>, transform_indices = @transform_7, window_bounds = array<i64: 288, 1152>}, {pipeline_mode = #tpu.pipeline_mode<synchronous>, transform_indices = @transform_8, window_bounds = array<i64: 1, 1152>}, {pipeline_mode = #tpu.pipeline_mode<synchronous>, transform_indices = @transform_9, window_bounds = array<i64: 1, 32>}, {pipeline_mode = #tpu.pipeline_mode<synchronous>, transform_indices = @transform_10, window_bounds = array<i64: 32, 16>}, {pipeline_mode = #tpu.pipeline_mode<synchronous>, transform_indices = @transform_11, window_bounds = array<i64: 1, 16>}, {pipeline_mode = #tpu.pipeline_mode<synchronous>, transform_indices = @transform_12, window_bounds = array<i64: 16, 10>}, {pipeline_mode = #tpu.pipeline_mode<synchronous>, transform_indices = @transform_13, window_bounds = array<i64: 1, 10>}, {transform_indices = @transform_14, window_bounds = array<i64: 8, 10>}]} {
    %c0 = arith.constant 0 : index
    %c0_0 = arith.constant 0 : index
    %0 = vector.load %arg1[%c0, %c0_0] : memref<8x16xf32, #tpu.memory_space<vmem>>, vector<8x16xf32>
    %c0_1 = arith.constant 0 : index
    %c0_2 = arith.constant 0 : index
    %1 = vector.load %arg2[%c0_1, %c0_2] : memref<16x288xf32, #tpu.memory_space<vmem>>, vector<16x288xf32>
    %cst = arith.constant dense<0.000000e+00> : vector<8x288xf32>
    %2 = tpu.matmul %0, %1, %cst {dimension_numbers = #tpu.dot_dimension_numbers<[1], [0], [0], [1], [0, 0, 1, 1], [], []>} : vector<8x16xf32>, vector<16x288xf32>, vector<8x288xf32> -> vector<8x288xf32>
    %c0_3 = arith.constant 0 : index
    %c0_4 = arith.constant 0 : index
    %3 = vector.load %arg3[%c0_3, %c0_4] : memref<1x288xf32, #tpu.memory_space<vmem>>, vector<1x288xf32>
    %4 = vector.broadcast %3 : vector<1x288xf32> to vector<8x288xf32>
    %5 = arith.addf %2, %4 : vector<8x288xf32>
    %cst_5 = arith.constant 0.000000e+00 : f32
    %6 = vector.broadcast %cst_5 : f32 to vector<8x288xf32>
    %7 = arith.maximumf %5, %6 : vector<8x288xf32>
    %c0_6 = arith.constant 0 : index
    %c0_7 = arith.constant 0 : index
    %8 = vector.load %arg4[%c0_6, %c0_7] : memref<1x32xf32, #tpu.memory_space<vmem>>, vector<1x32xf32>
    %9 = vector.shape_cast %8 : vector<1x32xf32> to vector<1x32xf32>
    %10 = vector.broadcast %9 : vector<1x32xf32> to vector<8x32xf32>
    %11 = vector.extract_strided_slice %7 {offsets = [0, 0], sizes = [8, 32], strides = [1, 1]} : vector<8x288xf32> to vector<8x32xf32>
    %12 = arith.maximumf %11, %10 : vector<8x32xf32>
    %13 = vector.extract_strided_slice %7 {offsets = [0, 32], sizes = [8, 32], strides = [1, 1]} : vector<8x288xf32> to vector<8x32xf32>
    %14 = vector.extract_strided_slice %7 {offsets = [0, 64], sizes = [8, 32], strides = [1, 1]} : vector<8x288xf32> to vector<8x32xf32>
    %15 = arith.maximumf %13, %14 : vector<8x32xf32>
    %16 = arith.maximumf %15, %10 : vector<8x32xf32>
    %17 = vector.extract_strided_slice %7 {offsets = [0, 96], sizes = [8, 32], strides = [1, 1]} : vector<8x288xf32> to vector<8x32xf32>
    %18 = vector.extract_strided_slice %7 {offsets = [0, 192], sizes = [8, 32], strides = [1, 1]} : vector<8x288xf32> to vector<8x32xf32>
    %19 = arith.maximumf %17, %18 : vector<8x32xf32>
    %20 = arith.maximumf %19, %10 : vector<8x32xf32>
    %21 = vector.extract_strided_slice %7 {offsets = [0, 128], sizes = [8, 32], strides = [1, 1]} : vector<8x288xf32> to vector<8x32xf32>
    %22 = vector.extract_strided_slice %7 {offsets = [0, 160], sizes = [8, 32], strides = [1, 1]} : vector<8x288xf32> to vector<8x32xf32>
    %23 = arith.maximumf %21, %22 : vector<8x32xf32>
    %24 = vector.extract_strided_slice %7 {offsets = [0, 224], sizes = [8, 32], strides = [1, 1]} : vector<8x288xf32> to vector<8x32xf32>
    %25 = arith.maximumf %23, %24 : vector<8x32xf32>
    %26 = vector.extract_strided_slice %7 {offsets = [0, 256], sizes = [8, 32], strides = [1, 1]} : vector<8x288xf32> to vector<8x32xf32>
    %27 = arith.maximumf %25, %26 : vector<8x32xf32>
    %28 = tpu.concatenate %12, %16, %20, %27 in 1 : vector<8x32xf32>, vector<8x32xf32>, vector<8x32xf32>, vector<8x32xf32> -> vector<8x128xf32>
    %c0_8 = arith.constant 0 : index
    %c0_9 = arith.constant 0 : index
    %29 = vector.load %arg5[%c0_8, %c0_9] : memref<128x800xf32, #tpu.memory_space<vmem>>, vector<128x800xf32>
    %cst_10 = arith.constant dense<0.000000e+00> : vector<8x800xf32>
    %30 = tpu.matmul %28, %29, %cst_10 {dimension_numbers = #tpu.dot_dimension_numbers<[1], [0], [0], [1], [0, 0, 1, 1], [], []>} : vector<8x128xf32>, vector<128x800xf32>, vector<8x800xf32> -> vector<8x800xf32>
    %c0_11 = arith.constant 0 : index
    %c0_12 = arith.constant 0 : index
    %31 = vector.load %arg6[%c0_11, %c0_12] : memref<1x800xf32, #tpu.memory_space<vmem>>, vector<1x800xf32>
    %32 = vector.broadcast %31 : vector<1x800xf32> to vector<8x800xf32>
    %33 = arith.addf %30, %32 : vector<8x800xf32>
    %cst_13 = arith.constant 0.000000e+00 : f32
    %34 = vector.broadcast %cst_13 : f32 to vector<8x800xf32>
    %35 = arith.maximumf %33, %34 : vector<8x800xf32>
    %c0_14 = arith.constant 0 : index
    %c0_15 = arith.constant 0 : index
    %36 = vector.load %arg7[%c0_14, %c0_15] : memref<1x32xf32, #tpu.memory_space<vmem>>, vector<1x32xf32>
    %37 = vector.shape_cast %36 : vector<1x32xf32> to vector<1x32xf32>
    %38 = vector.broadcast %37 : vector<1x32xf32> to vector<8x32xf32>
    %39 = vector.extract_strided_slice %35 {offsets = [0, 0], sizes = [8, 32], strides = [1, 1]} : vector<8x800xf32> to vector<8x32xf32>
    %40 = arith.maximumf %39, %38 : vector<8x32xf32>
    %41 = vector.extract_strided_slice %35 {offsets = [0, 32], sizes = [8, 32], strides = [1, 1]} : vector<8x800xf32> to vector<8x32xf32>
    %42 = vector.extract_strided_slice %35 {offsets = [0, 64], sizes = [8, 32], strides = [1, 1]} : vector<8x800xf32> to vector<8x32xf32>
    %43 = arith.maximumf %41, %42 : vector<8x32xf32>
    %44 = arith.maximumf %43, %38 : vector<8x32xf32>
    %45 = vector.extract_strided_slice %35 {offsets = [0, 96], sizes = [8, 32], strides = [1, 1]} : vector<8x800xf32> to vector<8x32xf32>
    %46 = vector.extract_strided_slice %35 {offsets = [0, 128], sizes = [8, 32], strides = [1, 1]} : vector<8x800xf32> to vector<8x32xf32>
    %47 = arith.maximumf %45, %46 : vector<8x32xf32>
    %48 = arith.maximumf %47, %38 : vector<8x32xf32>
    %49 = vector.extract_strided_slice %35 {offsets = [0, 160], sizes = [8, 32], strides = [1, 1]} : vector<8x800xf32> to vector<8x32xf32>
    %50 = vector.extract_strided_slice %35 {offsets = [0, 320], sizes = [8, 32], strides = [1, 1]} : vector<8x800xf32> to vector<8x32xf32>
    %51 = arith.maximumf %49, %50 : vector<8x32xf32>
    %52 = arith.maximumf %51, %38 : vector<8x32xf32>
    %53 = vector.extract_strided_slice %35 {offsets = [0, 192], sizes = [8, 32], strides = [1, 1]} : vector<8x800xf32> to vector<8x32xf32>
    %54 = vector.extract_strided_slice %35 {offsets = [0, 224], sizes = [8, 32], strides = [1, 1]} : vector<8x800xf32> to vector<8x32xf32>
    %55 = arith.maximumf %53, %54 : vector<8x32xf32>
    %56 = vector.extract_strided_slice %35 {offsets = [0, 352], sizes = [8, 32], strides = [1, 1]} : vector<8x800xf32> to vector<8x32xf32>
    %57 = arith.maximumf %55, %56 : vector<8x32xf32>
    %58 = vector.extract_strided_slice %35 {offsets = [0, 384], sizes = [8, 32], strides = [1, 1]} : vector<8x800xf32> to vector<8x32xf32>
    %59 = arith.maximumf %57, %58 : vector<8x32xf32>
    %60 = vector.extract_strided_slice %35 {offsets = [0, 256], sizes = [8, 32], strides = [1, 1]} : vector<8x800xf32> to vector<8x32xf32>
    %61 = vector.extract_strided_slice %35 {offsets = [0, 288], sizes = [8, 32], strides = [1, 1]} : vector<8x800xf32> to vector<8x32xf32>
    %62 = arith.maximumf %60, %61 : vector<8x32xf32>
    %63 = vector.extract_strided_slice %35 {offsets = [0, 416], sizes = [8, 32], strides = [1, 1]} : vector<8x800xf32> to vector<8x32xf32>
    %64 = arith.maximumf %62, %63 : vector<8x32xf32>
    %65 = vector.extract_strided_slice %35 {offsets = [0, 448], sizes = [8, 32], strides = [1, 1]} : vector<8x800xf32> to vector<8x32xf32>
    %66 = arith.maximumf %64, %65 : vector<8x32xf32>
    %67 = vector.extract_strided_slice %35 {offsets = [0, 480], sizes = [8, 32], strides = [1, 1]} : vector<8x800xf32> to vector<8x32xf32>
    %68 = vector.extract_strided_slice %35 {offsets = [0, 640], sizes = [8, 32], strides = [1, 1]} : vector<8x800xf32> to vector<8x32xf32>
    %69 = arith.maximumf %67, %68 : vector<8x32xf32>
    %70 = arith.maximumf %69, %38 : vector<8x32xf32>
    %71 = vector.extract_strided_slice %35 {offsets = [0, 512], sizes = [8, 32], strides = [1, 1]} : vector<8x800xf32> to vector<8x32xf32>
    %72 = vector.extract_strided_slice %35 {offsets = [0, 544], sizes = [8, 32], strides = [1, 1]} : vector<8x800xf32> to vector<8x32xf32>
    %73 = arith.maximumf %71, %72 : vector<8x32xf32>
    %74 = vector.extract_strided_slice %35 {offsets = [0, 672], sizes = [8, 32], strides = [1, 1]} : vector<8x800xf32> to vector<8x32xf32>
    %75 = arith.maximumf %73, %74 : vector<8x32xf32>
    %76 = vector.extract_strided_slice %35 {offsets = [0, 704], sizes = [8, 32], strides = [1, 1]} : vector<8x800xf32> to vector<8x32xf32>
    %77 = arith.maximumf %75, %76 : vector<8x32xf32>
    %78 = vector.extract_strided_slice %35 {offsets = [0, 576], sizes = [8, 32], strides = [1, 1]} : vector<8x800xf32> to vector<8x32xf32>
    %79 = vector.extract_strided_slice %35 {offsets = [0, 608], sizes = [8, 32], strides = [1, 1]} : vector<8x800xf32> to vector<8x32xf32>
    %80 = arith.maximumf %78, %79 : vector<8x32xf32>
    %81 = vector.extract_strided_slice %35 {offsets = [0, 736], sizes = [8, 32], strides = [1, 1]} : vector<8x800xf32> to vector<8x32xf32>
    %82 = arith.maximumf %80, %81 : vector<8x32xf32>
    %83 = vector.extract_strided_slice %35 {offsets = [0, 768], sizes = [8, 32], strides = [1, 1]} : vector<8x800xf32> to vector<8x32xf32>
    %84 = arith.maximumf %82, %83 : vector<8x32xf32>
    %85 = tpu.concatenate %40, %44, %48, %52, %59, %66, %70, %77, %84 in 1 : vector<8x32xf32>, vector<8x32xf32>, vector<8x32xf32>, vector<8x32xf32>, vector<8x32xf32>, vector<8x32xf32>, vector<8x32xf32>, vector<8x32xf32>, vector<8x32xf32> -> vector<8x288xf32>
    %c0_16 = arith.constant 0 : index
    %c0_17 = arith.constant 0 : index
    %86 = vector.load %arg8[%c0_16, %c0_17] : memref<288x1152xf32, #tpu.memory_space<vmem>>, vector<288x1152xf32>
    %cst_18 = arith.constant dense<0.000000e+00> : vector<8x1152xf32>
    %87 = tpu.matmul %85, %86, %cst_18 {dimension_numbers = #tpu.dot_dimension_numbers<[1], [0], [0], [1], [0, 0, 1, 1], [], []>} : vector<8x288xf32>, vector<288x1152xf32>, vector<8x1152xf32> -> vector<8x1152xf32>
    %c0_19 = arith.constant 0 : index
    %c0_20 = arith.constant 0 : index
    %88 = vector.load %arg9[%c0_19, %c0_20] : memref<1x1152xf32, #tpu.memory_space<vmem>>, vector<1x1152xf32>
    %89 = vector.broadcast %88 : vector<1x1152xf32> to vector<8x1152xf32>
    %90 = arith.addf %87, %89 : vector<8x1152xf32>
    %cst_21 = arith.constant 0.000000e+00 : f32
    %91 = vector.broadcast %cst_21 : f32 to vector<8x1152xf32>
    %92 = arith.maximumf %90, %91 : vector<8x1152xf32>
    %c0_22 = arith.constant 0 : index
    %c0_23 = arith.constant 0 : index
    %93 = vector.load %arg10[%c0_22, %c0_23] : memref<1x32xf32, #tpu.memory_space<vmem>>, vector<1x32xf32>
    %94 = vector.shape_cast %93 : vector<1x32xf32> to vector<1x32xf32>
    %95 = vector.broadcast %94 : vector<1x32xf32> to vector<8x32xf32>
    %96 = vector.extract_strided_slice %92 {offsets = [0, 0], sizes = [8, 32], strides = [1, 1]} : vector<8x1152xf32> to vector<8x32xf32>
    %97 = arith.maximumf %96, %95 : vector<8x32xf32>
    %98 = vector.extract_strided_slice %92 {offsets = [0, 32], sizes = [8, 32], strides = [1, 1]} : vector<8x1152xf32> to vector<8x32xf32>
    %99 = vector.extract_strided_slice %92 {offsets = [0, 64], sizes = [8, 32], strides = [1, 1]} : vector<8x1152xf32> to vector<8x32xf32>
    %100 = arith.maximumf %98, %99 : vector<8x32xf32>
    %101 = arith.maximumf %100, %95 : vector<8x32xf32>
    %102 = vector.extract_strided_slice %92 {offsets = [0, 96], sizes = [8, 32], strides = [1, 1]} : vector<8x1152xf32> to vector<8x32xf32>
    %103 = vector.extract_strided_slice %92 {offsets = [0, 128], sizes = [8, 32], strides = [1, 1]} : vector<8x1152xf32> to vector<8x32xf32>
    %104 = arith.maximumf %102, %103 : vector<8x32xf32>
    %105 = arith.maximumf %104, %95 : vector<8x32xf32>
    %106 = vector.extract_strided_slice %92 {offsets = [0, 160], sizes = [8, 32], strides = [1, 1]} : vector<8x1152xf32> to vector<8x32xf32>
    %107 = arith.maximumf %106, %95 : vector<8x32xf32>
    %108 = vector.extract_strided_slice %92 {offsets = [0, 192], sizes = [8, 32], strides = [1, 1]} : vector<8x1152xf32> to vector<8x32xf32>
    %109 = vector.extract_strided_slice %92 {offsets = [0, 384], sizes = [8, 32], strides = [1, 1]} : vector<8x1152xf32> to vector<8x32xf32>
    %110 = arith.maximumf %108, %109 : vector<8x32xf32>
    %111 = arith.maximumf %110, %95 : vector<8x32xf32>
    %112 = vector.extract_strided_slice %92 {offsets = [0, 224], sizes = [8, 32], strides = [1, 1]} : vector<8x1152xf32> to vector<8x32xf32>
    %113 = vector.extract_strided_slice %92 {offsets = [0, 256], sizes = [8, 32], strides = [1, 1]} : vector<8x1152xf32> to vector<8x32xf32>
    %114 = arith.maximumf %112, %113 : vector<8x32xf32>
    %115 = vector.extract_strided_slice %92 {offsets = [0, 416], sizes = [8, 32], strides = [1, 1]} : vector<8x1152xf32> to vector<8x32xf32>
    %116 = arith.maximumf %114, %115 : vector<8x32xf32>
    %117 = vector.extract_strided_slice %92 {offsets = [0, 448], sizes = [8, 32], strides = [1, 1]} : vector<8x1152xf32> to vector<8x32xf32>
    %118 = arith.maximumf %116, %117 : vector<8x32xf32>
    %119 = vector.extract_strided_slice %92 {offsets = [0, 288], sizes = [8, 32], strides = [1, 1]} : vector<8x1152xf32> to vector<8x32xf32>
    %120 = vector.extract_strided_slice %92 {offsets = [0, 320], sizes = [8, 32], strides = [1, 1]} : vector<8x1152xf32> to vector<8x32xf32>
    %121 = arith.maximumf %119, %120 : vector<8x32xf32>
    %122 = vector.extract_strided_slice %92 {offsets = [0, 480], sizes = [8, 32], strides = [1, 1]} : vector<8x1152xf32> to vector<8x32xf32>
    %123 = arith.maximumf %121, %122 : vector<8x32xf32>
    %124 = vector.extract_strided_slice %92 {offsets = [0, 512], sizes = [8, 32], strides = [1, 1]} : vector<8x1152xf32> to vector<8x32xf32>
    %125 = arith.maximumf %123, %124 : vector<8x32xf32>
    %126 = vector.extract_strided_slice %92 {offsets = [0, 352], sizes = [8, 32], strides = [1, 1]} : vector<8x1152xf32> to vector<8x32xf32>
    %127 = vector.extract_strided_slice %92 {offsets = [0, 544], sizes = [8, 32], strides = [1, 1]} : vector<8x1152xf32> to vector<8x32xf32>
    %128 = arith.maximumf %126, %127 : vector<8x32xf32>
    %129 = arith.maximumf %128, %95 : vector<8x32xf32>
    %130 = vector.extract_strided_slice %92 {offsets = [0, 576], sizes = [8, 32], strides = [1, 1]} : vector<8x1152xf32> to vector<8x32xf32>
    %131 = vector.extract_strided_slice %92 {offsets = [0, 768], sizes = [8, 32], strides = [1, 1]} : vector<8x1152xf32> to vector<8x32xf32>
    %132 = arith.maximumf %130, %131 : vector<8x32xf32>
    %133 = arith.maximumf %132, %95 : vector<8x32xf32>
    %134 = vector.extract_strided_slice %92 {offsets = [0, 608], sizes = [8, 32], strides = [1, 1]} : vector<8x1152xf32> to vector<8x32xf32>
    %135 = vector.extract_strided_slice %92 {offsets = [0, 640], sizes = [8, 32], strides = [1, 1]} : vector<8x1152xf32> to vector<8x32xf32>
    %136 = arith.maximumf %134, %135 : vector<8x32xf32>
    %137 = vector.extract_strided_slice %92 {offsets = [0, 800], sizes = [8, 32], strides = [1, 1]} : vector<8x1152xf32> to vector<8x32xf32>
    %138 = arith.maximumf %136, %137 : vector<8x32xf32>
    %139 = vector.extract_strided_slice %92 {offsets = [0, 832], sizes = [8, 32], strides = [1, 1]} : vector<8x1152xf32> to vector<8x32xf32>
    %140 = arith.maximumf %138, %139 : vector<8x32xf32>
    %141 = vector.extract_strided_slice %92 {offsets = [0, 672], sizes = [8, 32], strides = [1, 1]} : vector<8x1152xf32> to vector<8x32xf32>
    %142 = vector.extract_strided_slice %92 {offsets = [0, 704], sizes = [8, 32], strides = [1, 1]} : vector<8x1152xf32> to vector<8x32xf32>
    %143 = arith.maximumf %141, %142 : vector<8x32xf32>
    %144 = vector.extract_strided_slice %92 {offsets = [0, 864], sizes = [8, 32], strides = [1, 1]} : vector<8x1152xf32> to vector<8x32xf32>
    %145 = arith.maximumf %143, %144 : vector<8x32xf32>
    %146 = vector.extract_strided_slice %92 {offsets = [0, 896], sizes = [8, 32], strides = [1, 1]} : vector<8x1152xf32> to vector<8x32xf32>
    %147 = arith.maximumf %145, %146 : vector<8x32xf32>
    %148 = vector.extract_strided_slice %92 {offsets = [0, 736], sizes = [8, 32], strides = [1, 1]} : vector<8x1152xf32> to vector<8x32xf32>
    %149 = vector.extract_strided_slice %92 {offsets = [0, 928], sizes = [8, 32], strides = [1, 1]} : vector<8x1152xf32> to vector<8x32xf32>
    %150 = arith.maximumf %148, %149 : vector<8x32xf32>
    %151 = arith.maximumf %150, %95 : vector<8x32xf32>
    %152 = vector.extract_strided_slice %92 {offsets = [0, 960], sizes = [8, 32], strides = [1, 1]} : vector<8x1152xf32> to vector<8x32xf32>
    %153 = arith.maximumf %152, %95 : vector<8x32xf32>
    %154 = vector.extract_strided_slice %92 {offsets = [0, 992], sizes = [8, 32], strides = [1, 1]} : vector<8x1152xf32> to vector<8x32xf32>
    %155 = vector.extract_strided_slice %92 {offsets = [0, 1024], sizes = [8, 32], strides = [1, 1]} : vector<8x1152xf32> to vector<8x32xf32>
    %156 = arith.maximumf %154, %155 : vector<8x32xf32>
    %157 = arith.maximumf %156, %95 : vector<8x32xf32>
    %158 = vector.extract_strided_slice %92 {offsets = [0, 1056], sizes = [8, 32], strides = [1, 1]} : vector<8x1152xf32> to vector<8x32xf32>
    %159 = vector.extract_strided_slice %92 {offsets = [0, 1088], sizes = [8, 32], strides = [1, 1]} : vector<8x1152xf32> to vector<8x32xf32>
    %160 = arith.maximumf %158, %159 : vector<8x32xf32>
    %161 = arith.maximumf %160, %95 : vector<8x32xf32>
    %162 = vector.extract_strided_slice %92 {offsets = [0, 1120], sizes = [8, 32], strides = [1, 1]} : vector<8x1152xf32> to vector<8x32xf32>
    %163 = arith.maximumf %162, %95 : vector<8x32xf32>
    %164 = arith.addf %97, %101 : vector<8x32xf32>
    %165 = arith.addf %164, %105 : vector<8x32xf32>
    %166 = arith.addf %165, %107 : vector<8x32xf32>
    %167 = arith.addf %166, %111 : vector<8x32xf32>
    %168 = arith.addf %167, %118 : vector<8x32xf32>
    %169 = arith.addf %168, %125 : vector<8x32xf32>
    %170 = arith.addf %169, %129 : vector<8x32xf32>
    %171 = arith.addf %170, %133 : vector<8x32xf32>
    %172 = arith.addf %171, %140 : vector<8x32xf32>
    %173 = arith.addf %172, %147 : vector<8x32xf32>
    %174 = arith.addf %173, %151 : vector<8x32xf32>
    %175 = arith.addf %174, %153 : vector<8x32xf32>
    %176 = arith.addf %175, %157 : vector<8x32xf32>
    %177 = arith.addf %176, %161 : vector<8x32xf32>
    %178 = arith.addf %177, %163 : vector<8x32xf32>
    %c0_24 = arith.constant 0 : index
    %c0_25 = arith.constant 0 : index
    %179 = vector.load %arg11[%c0_24, %c0_25] : memref<32x16xf32, #tpu.memory_space<vmem>>, vector<32x16xf32>
    %cst_26 = arith.constant dense<0.000000e+00> : vector<8x16xf32>
    %180 = tpu.matmul %178, %179, %cst_26 {dimension_numbers = #tpu.dot_dimension_numbers<[1], [0], [0], [1], [0, 0, 1, 1], [], []>} : vector<8x32xf32>, vector<32x16xf32>, vector<8x16xf32> -> vector<8x16xf32>
    %c0_27 = arith.constant 0 : index
    %c0_28 = arith.constant 0 : index
    %181 = vector.load %arg12[%c0_27, %c0_28] : memref<1x16xf32, #tpu.memory_space<vmem>>, vector<1x16xf32>
    %182 = vector.broadcast %181 : vector<1x16xf32> to vector<8x16xf32>
    %183 = arith.addf %180, %182 : vector<8x16xf32>
    %cst_29 = arith.constant 0.000000e+00 : f32
    %184 = vector.broadcast %cst_29 : f32 to vector<8x16xf32>
    %185 = arith.maximumf %183, %184 : vector<8x16xf32>
    %c0_30 = arith.constant 0 : index
    %c0_31 = arith.constant 0 : index
    %186 = vector.load %arg13[%c0_30, %c0_31] : memref<16x10xf32, #tpu.memory_space<vmem>>, vector<16x10xf32>
    %cst_32 = arith.constant dense<0.000000e+00> : vector<8x10xf32>
    %187 = tpu.matmul %185, %186, %cst_32 {dimension_numbers = #tpu.dot_dimension_numbers<[1], [0], [0], [1], [0, 0, 1, 1], [], []>} : vector<8x16xf32>, vector<16x10xf32>, vector<8x10xf32> -> vector<8x10xf32>
    %c0_33 = arith.constant 0 : index
    %c0_34 = arith.constant 0 : index
    %188 = vector.load %arg14[%c0_33, %c0_34] : memref<1x10xf32, #tpu.memory_space<vmem>>, vector<1x10xf32>
    %189 = vector.broadcast %188 : vector<1x10xf32> to vector<8x10xf32>
    %190 = arith.addf %187, %189 : vector<8x10xf32>
    %c0_35 = arith.constant 0 : index
    %c0_36 = arith.constant 0 : index
    %191 = vector.load %arg15[%c0_35, %c0_36] : memref<8x10xf32, #tpu.memory_space<vmem>>, vector<8x10xf32>
    tpu.vector_store %arg15[%c0_35, %c0_36], %190 {strides = array<i32>} : memref<8x10xf32, #tpu.memory_space<vmem>>, vector<8x10xf32>,
    return
  }
  func.func @transform_0(%arg0: i32) -> (i32, i32) {
    %c0_i32 = arith.constant 0 : i32
    %c0_i32_0 = arith.constant 0 : i32
    return %arg0, %c0_i32 : i32, i32
  }
  func.func @transform_1(%arg0: i32) -> (i32, i32) {
    %c0_i32 = arith.constant 0 : i32
    %c0_i32_0 = arith.constant 0 : i32
    %c0_i32_1 = arith.constant 0 : i32
    return %c0_i32, %c0_i32_0 : i32, i32
  }
  func.func @transform_2(%arg0: i32) -> (i32, i32) {
    %c0_i32 = arith.constant 0 : i32
    %c0_i32_0 = arith.constant 0 : i32
    %c0_i32_1 = arith.constant 0 : i32
    return %c0_i32, %c0_i32_0 : i32, i32
  }
  func.func @transform_3(%arg0: i32) -> (i32, i32) {
    %c0_i32 = arith.constant 0 : i32
    %c0_i32_0 = arith.constant 0 : i32
    %c0_i32_1 = arith.constant 0 : i32
    return %c0_i32, %c0_i32_0 : i32, i32
  }
  func.func @transform_4(%arg0: i32) -> (i32, i32) {
    %c0_i32 = arith.constant 0 : i32
    %c0_i32_0 = arith.constant 0 : i32
    %c0_i32_1 = arith.constant 0 : i32
    return %c0_i32, %c0_i32_0 : i32, i32
  }
  func.func @transform_5(%arg0: i32) -> (i32, i32) {
    %c0_i32 = arith.constant 0 : i32
    %c0_i32_0 = arith.constant 0 : i32
    %c0_i32_1 = arith.constant 0 : i32
    return %c0_i32, %c0_i32_0 : i32, i32
  }
  func.func @transform_6(%arg0: i32) -> (i32, i32) {
    %c0_i32 = arith.constant 0 : i32
    %c0_i32_0 = arith.constant 0 : i32
    %c0_i32_1 = arith.constant 0 : i32
    return %c0_i32, %c0_i32_0 : i32, i32
  }
  func.func @transform_7(%arg0: i32) -> (i32, i32) {
    %c0_i32 = arith.constant 0 : i32
    %c0_i32_0 = arith.constant 0 : i32
    %c0_i32_1 = arith.constant 0 : i32
    return %c0_i32, %c0_i32_0 : i32, i32
  }
  func.func @transform_8(%arg0: i32) -> (i32, i32) {
    %c0_i32 = arith.constant 0 : i32
    %c0_i32_0 = arith.constant 0 : i32
    %c0_i32_1 = arith.constant 0 : i32
    return %c0_i32, %c0_i32_0 : i32, i32
  }
  func.func @transform_9(%arg0: i32) -> (i32, i32) {
    %c0_i32 = arith.constant 0 : i32
    %c0_i32_0 = arith.constant 0 : i32
    %c0_i32_1 = arith.constant 0 : i32
    return %c0_i32, %c0_i32_0 : i32, i32
  }
  func.func @transform_10(%arg0: i32) -> (i32, i32) {
    %c0_i32 = arith.constant 0 : i32
    %c0_i32_0 = arith.constant 0 : i32
    %c0_i32_1 = arith.constant 0 : i32
    return %c0_i32, %c0_i32_0 : i32, i32
  }
  func.func @transform_11(%arg0: i32) -> (i32, i32) {
    %c0_i32 = arith.constant 0 : i32
    %c0_i32_0 = arith.constant 0 : i32
    %c0_i32_1 = arith.constant 0 : i32
    return %c0_i32, %c0_i32_0 : i32, i32
  }
  func.func @transform_12(%arg0: i32) -> (i32, i32) {
    %c0_i32 = arith.constant 0 : i32
    %c0_i32_0 = arith.constant 0 : i32
    %c0_i32_1 = arith.constant 0 : i32
    return %c0_i32, %c0_i32_0 : i32, i32
  }
  func.func @transform_13(%arg0: i32) -> (i32, i32) {
    %c0_i32 = arith.constant 0 : i32
    %c0_i32_0 = arith.constant 0 : i32
    %c0_i32_1 = arith.constant 0 : i32
    return %c0_i32, %c0_i32_0 : i32, i32
  }
  func.func @transform_14(%arg0: i32) -> (i32, i32) {
    %c0_i32 = arith.constant 0 : i32
    %c0_i32_0 = arith.constant 0 : i32
    return %arg0, %c0_i32 : i32, i32
  }
}

</mosaic_0001>

<bundles_post_ra>
// kernel: sp_2d_3layer_forward.1
= control target key start
LH: loop header
LB: loop body
LE: loop exit
PB: predicated region body
PF: predicated region fallthrough
CT: control target
= control target key end

     0   :  { %19 = vsyncpa [#allocation3], 0  ;;  %s3610_s0 = inlined_call_operand.vmem [shape: f32[8,16], index: 0, kind: input, shape index: {}]   ;;  %s3611_s1 = inlined_call_operand.hbm [shape: f32[16,288], index: 1, kind: input, shape index: {}]   ;;  %s3612_s2 = inlined_call_operand.hbm [shape: f32[1,288], index: 2, kind: input, shape index: {}]   ;;  %s3613_s3 = inlined_call_operand.hbm [shape: f32[1,32], index: 3, kind: input, shape index: {}]   ;;  %s3614_s4 = inlined_call_operand.vmem [shape: f32[128,800], index: 4, kind: input, shape index: {}]   ;;  %s3615_s5 = inlined_call_operand.hbm [shape: f32[1,800], index: 5, kind: input, shape index: {}]   ;;  %s3616_s6 = inlined_call_operand.hbm [shape: f32[1,32], index: 6, kind: input, shape index: {}]   ;;  %s3617_s7 = inlined_call_operand.hbm [shape: f32[288,1152], index: 7, kind: input, shape index: {}]   ;;  %s3618_s8 = inlined_call_operand.hbm [shape: f32[1,1152], index: 8, kind: input, shape index: {}]   ;;  %s3619_s9 = inlined_call_operand.hbm [shape: f32[1,32], index: 9, kind: input, shape index: {}]   ;;  %s3620_s10 = inlined_call_operand.vmem [shape: f32[32,16], index: 10, kind: input, shape index: {}]   ;;  %s3621_s11 = inlined_call_operand.hbm [shape: f32[1,16], index: 11, kind: input, shape index: {}]   ;;  %s3622_s12 = inlined_call_operand.hbm [shape: f32[16,10], index: 12, kind: input, shape index: {}]   ;;  %s3623_s13 = inlined_call_operand.hbm [shape: f32[1,10], index: 13, kind: input, shape index: {}]   ;;  %s3624_s14 = inlined_call_operand.vmem [shape: f32[8,10], index: 14, kind: output, shape index: {}]  }
   0x1   :  { %20 = vsyncpa [#allocation5], 0 }
   0x2   :  { %21 = vsyncpa [#allocation8], 0 }
   0x3   :  { %22 = vsyncpa [#allocation11], 0 }
   0x4   :  { %23 = vsyncpa [#allocation14], 0 }
   0x5   :  { %24 = vsyncpa [#allocation17], 0  ;;  %s2817_s29 = smov [#allocation4]   ;;  %s2818_s15 = smov [#allocation7]  }
   0x6   :  { %s45_s30 = sshll.u32 %s2817_s29, 4  ;;  %s67_s16 = sshll.u32 %s2818_s15, 4  ;;  %s46_s30 = int_to_ptr.vmem [resolvable:$true] %s45_s30  ;;  %s68_s16 = int_to_ptr.vmem [resolvable:$true] %s67_s16 }
   0x7   :  { %s2593_s17 = scalar_lea.vmem %s46_s30, 48  ;;  %s2597_s18 = scalar_lea.vmem %s46_s30, 64 }
   0x8   :  { %p2594_p0 = scmp.ne.s32.totalorder %s46_s30, %s2593_s17  ;;  %p2598_p1 = scmp.lt.s32.totalorder %s46_s30, %s46_s30 }
   0x9   :  { %p2599_p2 = scmp.lt.s32.totalorder %s2597_s18, %s2593_s17 }
   0xb   :  { %p2600_p3 = por %p2599_p2, %p2598_p1 }
   0xd   :  { %p2601_p4 = pnand %p2600_p3, %p2594_p0 }
   0xf   :  { %2604 = shalt.err (!%p2601_p4)
}
  0x10   :  { %48 = dma.hbm_to_vmem [thread:$0]  %s3612_s2, 48, %s46_s30, [#allocation5]  }
  0x11   :  { %s2613_s21 = scalar_lea.vmem %s68_s16, 112  ;;  %s2617_s22 = scalar_lea.vmem %s68_s16, 128 }
  0x12   :  { %p2614_p5 = scmp.ne.s32.totalorder %s68_s16, %s2613_s21  ;;  %p2618_p6 = scmp.lt.s32.totalorder %s68_s16, %s68_s16 }
  0x13   :  { %p2619_p7 = scmp.lt.s32.totalorder %s2617_s22, %s2613_s21 }
  0x15   :  { %p2620_p8 = por %p2619_p7, %p2618_p6 }
  0x17   :  { %p2621_p9 = pnand %p2620_p8, %p2614_p5 }
  0x19   :  { %2624 = shalt.err (!%p2621_p9)
}
  0x1a   :  { %70 = dma.hbm_to_vmem [thread:$0]  %s3615_s5, 112, %s68_s16, [#allocation8]  }
  0x1b   :  { %s2819_s25 = smov [#allocation10]  }
  0x1c   :  { %s86_s26 = sshll.u32 %s2819_s25, 4  ;;  %s87_s26 = int_to_ptr.vmem [resolvable:$true] %s86_s26 }
  0x1d   :  { %s2633_s27 = scalar_lea.vmem %s87_s26, 41472  ;;  %p2638_p11 = scmp.lt.s32.totalorder %s87_s26, %s87_s26 }
  0x1e   :  { %p2634_p10 = scmp.ne.s32.totalorder %s87_s26, %s2633_s27  ;;  %p2639_p12 = scmp.lt.s32.totalorder %s2633_s27, %s2633_s27 }
  0x20   :  { %p2640_p13 = por %p2639_p12, %p2638_p11 }
  0x22   :  { %p2641_p0 = pnand %p2640_p13, %p2634_p10 }
  0x24   :  { %2644 = shalt.err (!%p2641_p0)
}
  0x25   :  { %s2820_s2 = smov 1152   ;;  %s2821_s28 = smov 72  }
  0x26   :  { %92 = dma.hbm_to_vmem [thread:$0]  %s3617_s7, 41472, %s87_s26, [#allocation11], %s2820_s2, %s2820_s2, %s2821_s28  }
  0x27   :  { %s2822_s15 = smov [#allocation13]   ;;  %s2823_s5 = smov [#allocation16]  }
  0x28   :  { %s109_s17 = sshll.u32 %s2822_s15, 4  ;;  %s130_s16 = sshll.u32 %s2823_s5, 4  ;;  %s110_s17 = int_to_ptr.vmem [resolvable:$true] %s109_s17  ;;  %s131_s16 = int_to_ptr.vmem [resolvable:$true] %s130_s16 }
  0x29   :  { %s2653_s18 = scalar_lea.vmem %s110_s17, 16  ;;  %s2657_s19 = scalar_lea.vmem %s110_s17, 32 }
  0x2a   :  { %p2654_p1 = scmp.ne.s32.totalorder %s110_s17, %s2653_s18  ;;  %p2658_p2 = scmp.lt.s32.totalorder %s110_s17, %s110_s17 }
  0x2b   :  { %p2659_p3 = scmp.lt.s32.totalorder %s2657_s19, %s2653_s18 }
  0x2d   :  { %p2660_p4 = por %p2659_p3, %p2658_p2 }
  0x2f   :  { %p2661_p5 = pnand %p2660_p4, %p2654_p1 }
  0x31   :  { %2664 = shalt.err (!%p2661_p5)
}
  0x32   :  { %112 = dma.hbm_to_vmem [thread:$0]  %s3619_s9, 16, %s110_s17, [#allocation14]  }
  0x33   :  { %s2673_s22 = scalar_lea.vmem %s131_s16, 256  ;;  %p2678_p7 = scmp.lt.s32.totalorder %s131_s16, %s131_s16 }
  0x34   :  { %p2674_p6 = scmp.ne.s32.totalorder %s131_s16, %s2673_s22  ;;  %p2679_p8 = scmp.lt.s32.totalorder %s2673_s22, %s2673_s22 }
  0x36   :  { %p2680_p9 = por %p2679_p8, %p2678_p7 }
  0x38   :  { %p2681_p10 = pnand %p2680_p9, %p2674_p6 }
  0x3a   :  { %2684 = shalt.err (!%p2681_p10)
}
  0x3b   :  { %s2824_s7 = smov 128   ;;  %s2825_s23 = smov 8  }
  0x3c   :  { %136 = dma.hbm_to_vmem [thread:$0]  %s3622_s12, 256, %s131_s16, [#allocation17], %s2824_s7, %s2824_s7, %s2825_s23  }
  0x3d   :  { %s2826_s26 = smov [#allocation2]  }
  0x3e   :  { %s32_s27 = sshll.u32 %s2826_s26, 4  ;;  %s33_s27 = int_to_ptr.vmem [resolvable:$true] %s32_s27 }
  0x3f   :  { %s2693_s2 = scalar_lea.vmem %s33_s27, 768  ;;  %p2698_p12 = scmp.lt.s32.totalorder %s33_s27, %s33_s27 }
  0x40   :  { %p2694_p11 = scmp.ne.s32.totalorder %s33_s27, %s2693_s2  ;;  %p2699_p13 = scmp.lt.s32.totalorder %s2693_s2, %s2693_s2 }
  0x42   :  { %p2700_p0 = por %p2699_p13, %p2698_p12 }
  0x44   :  { %p2701_p1 = pnand %p2700_p0, %p2694_p11 }
  0x46   :  { %2704 = shalt.err (!%p2701_p1)
}
  0x47   :  { %s2827_s9 = smov 384   ;;  %s2828_s28 = smov 24  }
  0x48   :  { %38 = dma.hbm_to_vmem [thread:$0]  %s3611_s1, 768, %s33_s27, [#allocation3], %s2827_s9, %s2827_s9, %s2828_s28  }
  0x49   :  { %s2829_s15 = smov [#allocation6]   ;;  %s2830_s5 = smov [#allocation9]  }
  0x4a   :  { %s55_s17 = sshll.u32 %s2829_s15, 4  ;;  %s77_s12 = sshll.u32 %s2830_s5, 4  ;;  %s56_s17 = int_to_ptr.vmem [resolvable:$true] %s55_s17  ;;  %s78_s12 = int_to_ptr.vmem [resolvable:$true] %s77_s12 }
  0x4b   :  { %s2713_s16 = scalar_lea.vmem %s56_s17, 16  ;;  %s2717_s18 = scalar_lea.vmem %s56_s17, 32 }
  0x4c   :  { %p2714_p2 = scmp.ne.s32.totalorder %s56_s17, %s2713_s16  ;;  %p2718_p3 = scmp.lt.s32.totalorder %s56_s17, %s56_s17 }
  0x4d   :  { %p2719_p4 = scmp.lt.s32.totalorder %s2717_s18, %s2713_s16 }
  0x4f   :  { %p2720_p5 = por %p2719_p4, %p2718_p3 }
  0x51   :  { %p2721_p6 = pnand %p2720_p5, %p2714_p2 }
  0x53   :  { %2724 = shalt.err (!%p2721_p6)
}
  0x54   :  { %58 = dma.hbm_to_vmem [thread:$0]  %s3613_s3, 16, %s56_s17, [#allocation5]  }
  0x55   :  { %s2733_s21 = scalar_lea.vmem %s78_s12, 16  ;;  %s2737_s1 = scalar_lea.vmem %s78_s12, 32 }
  0x56   :  { %p2734_p7 = scmp.ne.s32.totalorder %s78_s12, %s2733_s21  ;;  %p2738_p8 = scmp.lt.s32.totalorder %s78_s12, %s78_s12 }
  0x57   :  { %p2739_p9 = scmp.lt.s32.totalorder %s2737_s1, %s2733_s21 }
  0x59   :  { %p2740_p10 = por %p2739_p9, %p2738_p8 }
  0x5b   :  { %p2741_p11 = pnand %p2740_p10, %p2734_p7 }
  0x5d   :  { %2744 = shalt.err (!%p2741_p11)
}
  0x5e   :  { %80 = dma.hbm_to_vmem [thread:$0]  %s3616_s6, 16, %s78_s12, [#allocation8]  }
  0x5f   :  { %s2831_s23 = smov [#allocation12]   ;;  %s2832_s25 = smov [#allocation15]  }
  0x60   :  { %s99_s24 = sshll.u32 %s2831_s23, 4  ;;  %s121_s26 = sshll.u32 %s2832_s25, 4  ;;  %s100_s24 = int_to_ptr.vmem [resolvable:$true] %s99_s24  ;;  %s122_s26 = int_to_ptr.vmem [resolvable:$true] %s121_s26 }
  0x61   :  { %s2753_s27 = scalar_lea.vmem %s100_s24, 144  ;;  %s2757_s3 = scalar_lea.vmem %s100_s24, 160 }
  0x62   :  { %p2754_p12 = scmp.ne.s32.totalorder %s100_s24, %s2753_s27  ;;  %p2758_p13 = scmp.lt.s32.totalorder %s100_s24, %s100_s24 }
  0x63   :  { %p2759_p0 = scmp.lt.s32.totalorder %s2757_s3, %s2753_s27 }
  0x65   :  { %p2760_p1 = por %p2759_p0, %p2758_p13 }
  0x67   :  { %p2761_p2 = pnand %p2760_p1, %p2754_p12 }
  0x69   :  { %2764 = shalt.err (!%p2761_p2)
}
  0x6a   :  { %102 = dma.hbm_to_vmem [thread:$0]  %s3618_s8, 144, %s100_s24, [#allocation11]  }
  0x6b   :  { %s2773_s28 = scalar_lea.vmem %s122_s26, 16  ;;  %s2777_s6 = scalar_lea.vmem %s122_s26, 32 }
  0x6c   :  { %p2774_p3 = scmp.ne.s32.totalorder %s122_s26, %s2773_s28  ;;  %p2778_p4 = scmp.lt.s32.totalorder %s122_s26, %s122_s26 }
  0x6d   :  { %p2779_p5 = scmp.lt.s32.totalorder %s2777_s6, %s2773_s28 }
  0x6f   :  { %p2780_p6 = por %p2779_p5, %p2778_p4 }
  0x71   :  { %p2781_p7 = pnand %p2780_p6, %p2774_p3 }
  0x73   :  { %2784 = shalt.err (!%p2781_p7)
}
  0x74   :  { %124 = dma.hbm_to_vmem [thread:$0]  %s3621_s11, 16, %s122_s26, [#allocation14]  }
  0x75   :  { %s2833_s15 = smov [#allocation18]  }
  0x76   :  { %s143_s17 = sshll.u32 %s2833_s15, 4  ;;  %s144_s17 = int_to_ptr.vmem [resolvable:$true] %s143_s17 }
  0x77   :  { %s2793_s5 = scalar_lea.vmem %s144_s17, 16  ;;  %s2797_s12 = scalar_lea.vmem %s144_s17, 32 }
  0x78   :  { %p2794_p8 = scmp.ne.s32.totalorder %s144_s17, %s2793_s5  ;;  %p2798_p9 = scmp.lt.s32.totalorder %s144_s17, %s144_s17 }
  0x79   :  { %p2799_p10 = scmp.lt.s32.totalorder %s2797_s12, %s2793_s5 }
  0x7b   :  { %p2800_p11 = por %p2799_p10, %p2798_p9 }
  0x7d   :  { %p2801_p12 = pnand %p2800_p11, %p2794_p8 }
  0x7f   :  { %2804 = shalt.err (!%p2801_p12)
}
  0x80   :  { %146 = dma.hbm_to_vmem [thread:$0]  %s3623_s13, 16, %s144_s17, [#allocation17]  }
  0x81   :  { %2805 = dma.done.wait [#allocation3], 768  }
  0x82   :  { %2806 = vsyncadd [#allocation3], 4294966528 }
  0x83   :  { %2807 = dma.done.wait [#allocation5], 64  }
  0x84   :  { %2808 = vsyncadd [#allocation5], 4294967232 }
  0x85   :  { %2809 = dma.done.wait [#allocation8], 128  }
  0x86   :  { %2810 = vsyncadd [#allocation8], 4294967168 }
  0x87   :  { %2811 = dma.done.wait [#allocation11], 41616  }
  0x88   :  { %2812 = vsyncadd [#allocation11], 4294925680 }
  0x89   :  { %2813 = dma.done.wait [#allocation14], 32  }
  0x8a   :  { %2814 = vsyncadd [#allocation14], 4294967264 }
  0x8b   :  { %2815 = dma.done.wait [#allocation17], 272  }
  0x8c   :  { %2816 = vsyncadd [#allocation17], 4294967024  ;;  %v2834_v0 = vmov 0.0   ;;  %v185_v1 = vld [vmem:[#allocation2 + $0x20] sm:$0xff]  ;;  %v184_v2 = vld [vmem:[#allocation2 + $0x18] sm:$0xff]  ;;  %vm204_vm0 = vcmask 130048   ;;  %v189_v9 = vlaneseq }
  0x8d   :  { %272 = vmatprep.mubr.f32.mxu1 %v2834_v0  ;;  %611 = vmatprep.mubr.f32.mxu0 %v2834_v0  ;;  %v182_v3 = vld [vmem:[#allocation2 + $0x8] sm:$0xff]  ;;  %v181_v4 = vld [vmem:[#allocation2] sm:$0xff]  ;;  %v183_v7 = vld [vmem:[#allocation2 + $0x10] sm:$0xff]  ;;  %vm2835_vm1 = vmmov 0   ;;  %s2837_s21 = smov 32   ;;  %vm392_vm2 = vcmask 261120  }
  0x8e   :  { %236 = vmatprep.subr.mxu1 %v185_v1  ;;  %v180_v5 = vld [vmem:[%s3610_s0] sm:$0xff]  ;;  %v186_v6 = vld [vmem:[#allocation2 + $0x28] sm:$0xff]  ;;  %v2959_v8 = vld [vmem:[#allocation6] ss:$0 sm:$0xff]  ;;  %s2836_s0 = smov 96   ;;  %v2963_v10 = vshrl.u32 %v189_v9, 7 }
  0x8f   :  { %237 = vmatpush1.msra.mxu1 %v184_v2  ;;  %374 = vrot.lane.b32.xlu1 %v2959_v8, %s2836_s0  ;;  %v2968_v12 = vld [vmem:[#allocation4] sm:$0x7]  ;;  %v506_v23 = vld [vmem:[%s3614_s4 + $0x360] sm:$0xff]  ;;  %v503_v24 = vld [vmem:[%s3614_s4 + $0x348] sm:$0xff]  ;;  %vm394_vm3 = vcmask 523264   ;;  %vm396_vm4 = vcmask 785408  }
  0x90   :  { %238 = vmatprep.subr.mxu1 %v182_v3  ;;  %v2966_v11 = vsub.s32 0, %v2963_v10  ;;  %v2971_v13 = vsub.s32 1, %v2963_v10  ;;  %v504_v22 = vld [vmem:[%s3614_s4 + $0x350] sm:$0xff]  ;;  %v505_v26 = vld [vmem:[%s3614_s4 + $0x358] sm:$0xff]  ;;  %v499_v28 = vld [vmem:[%s3614_s4 + $0x328] sm:$0xff]  ;;  %vm2366_vm5 = vcmask 80896  }
  0x91   :  { %239 = vmatpush1.msra.mxu1 %v181_v4  ;;  %547 = vmatprep.subr.mxu0 %v504_v22  ;;  %v497_v27 = vld [vmem:[%s3614_s4 + $0x318] sm:$0xff]  ;;  %v496_v30 = vld [vmem:[%s3614_s4 + $0x310] sm:$0xff]  ;;  %v498_v31 = vld [vmem:[%s3614_s4 + $0x320] sm:$0xff] }
  0x92   :  { %2378 = vmatmul.mubr.msk.f32.vlgmr.msra.gmra.mxu1 %vm204_vm0, %v180_v5  ;;  %2461 = vmatprep.subr.mxu1 %v2834_v0  ;;  %v192_v14 = vrot.slane %v2968_v12, %v2966_v11  ;;  %v196_v15 = vrot.slane %v2968_v12, %v2971_v13  ;;  %v490_v32 = vld [vmem:[%s3614_s4 + $0x2e0] sm:$0xff]  ;;  %v492_v33 = vld [vmem:[%s3614_s4 + $0x2f0] sm:$0xff]  ;;  %v489_v34 = vld [vmem:[%s3614_s4 + $0x2d8] sm:$0xff] }
  0x93   :  { %2462 = vmatpush3.msra.mxu1 %v186_v6  ;;  %2465 = vmatprep.mubr.msk.f32.mxu1 %vm2835_vm1, %v2834_v0  ;;  %v491_v35 = vld [vmem:[%s3614_s4 + $0x2e8] sm:$0xff]  ;;  %v485_v37 = vld [vmem:[%s3614_s4 + $0x2b8] sm:$0xff]  ;;  %v482_v38 = vld [vmem:[%s3614_s4 + $0x2a0] sm:$0xff] }
  0x94   :  { %2463 = vmatprep.subr.mxu1 %v2834_v0  ;;  %548 = vmatpush1.msra.mxu0 %v503_v24  ;;  %v483_v36 = vld [vmem:[%s3614_s4 + $0x2a8] sm:$0xff]  ;;  %v484_v39 = vld [vmem:[%s3614_s4 + $0x2b0] sm:$0xff]  ;;  %v478_v41 = vld [vmem:[%s3614_s4 + $0x280] sm:$0xff] }
  0x95   :  { %2464 = vmatpush3.msra.mxu1 %v183_v7  ;;  %549 = vmatprep.subr.mxu0 %v497_v27  ;;  %v476_v40 = vld [vmem:[%s3614_s4 + $0x270] sm:$0xff]  ;;  %v475_v42 = vld [vmem:[%s3614_s4 + $0x268] sm:$0xff]  ;;  %v477_v43 = vld [vmem:[%s3614_s4 + $0x278] sm:$0xff]  ;;  %v3166_v27 = vsub.s32 2, %v2963_v10 }
  0x96   :  { %2466 = vmatmul.mubr.msk.f32.vlgmr.msra.gmra.mxu1 %vm204_vm0, %v180_v5  ;;  %618 = vmatprep.subr.mxu1 %v506_v23  ;;  %v469_v44 = vld [vmem:[%s3614_s4 + $0x238] sm:$0xff]  ;;  %v471_v45 = vld [vmem:[%s3614_s4 + $0x248] sm:$0xff]  ;;  %v468_v46 = vld [vmem:[%s3614_s4 + $0x230] sm:$0xff] }
  0x97   :  { %682 = vmatprep.mubr.f32.mxu1 %v2834_v0  ;;  %619 = vmatpush1.msra.mxu1 %v505_v26  ;;  %v470_v47 = vld [vmem:[%s3614_s4 + $0x240] sm:$0xff]  ;;  %v464_v49 = vld [vmem:[%s3614_s4 + $0x210] sm:$0xff]  ;;  %v461_v50 = vld [vmem:[%s3614_s4 + $0x1f8] sm:$0xff] }
  0x98   :  { %620 = vmatprep.subr.mxu1 %v499_v28  ;;  %550 = vmatpush1.msra.mxu0 %v496_v30  ;;  %v462_v48 = vld [vmem:[%s3614_s4 + $0x200] sm:$0xff]  ;;  %v463_v51 = vld [vmem:[%s3614_s4 + $0x208] sm:$0xff]  ;;  %v457_v53 = vld [vmem:[%s3614_s4 + $0x1d8] sm:$0xff]  ;;  %v200_v28 = vrot.slane %v2968_v12, %v3166_v27 }
  0x99   :  { %621 = vmatpush1.msra.mxu1 %v498_v31  ;;  %551 = vmatprep.subr.mxu0 %v490_v32  ;;  %v455_v52 = vld [vmem:[%s3614_s4 + $0x1c8] sm:$0xff]  ;;  %v454_v54 = vld [vmem:[%s3614_s4 + $0x1c0] sm:$0xff]  ;;  %v456_v55 = vld [vmem:[%s3614_s4 + $0x1d0] sm:$0xff] }
  0x9a   :  { %622 = vmatprep.subr.mxu1 %v492_v33  ;;  %552 = vmatpush1.msra.mxu0 %v489_v34  ;;  %v448_v56 = vld [vmem:[%s3614_s4 + $0x190] sm:$0xff]  ;;  %v450_v57 = vld [vmem:[%s3614_s4 + $0x1a0] sm:$0xff]  ;;  %v447_v58 = vld [vmem:[%s3614_s4 + $0x188] sm:$0xff] }
  0x9b   :  { %623 = vmatpush1.msra.mxu1 %v491_v35  ;;  %553 = vmatprep.subr.mxu0 %v483_v36  ;;  %v449_v59 = vld [vmem:[%s3614_s4 + $0x198] sm:$0xff]  ;;  %v443_v61 = vld [vmem:[%s3614_s4 + $0x168] sm:$0xff]  ;;  %v440_v62 = vld [vmem:[%s3614_s4 + $0x150] sm:$0xff] }
  0x9c   :  { %624 = vmatprep.subr.mxu1 %v485_v37  ;;  %554 = vmatpush1.msra.mxu0 %v482_v38  ;;  %v441_v60 = vld [vmem:[%s3614_s4 + $0x158] sm:$0xff]  ;;  %v442_v63 = vld [vmem:[%s3614_s4 + $0x160] sm:$0xff]  ;;  %v436_v2 = vld [vmem:[%s3614_s4 + $0x130] sm:$0xff] }
  0x9d   :  { %625 = vmatpush1.msra.mxu1 %v484_v39  ;;  %555 = vmatprep.subr.mxu0 %v476_v40  ;;  %v434_v1 = vld [vmem:[%s3614_s4 + $0x120] sm:$0xff]  ;;  %v433_v3 = vld [vmem:[%s3614_s4 + $0x118] sm:$0xff]  ;;  %v435_v4 = vld [vmem:[%s3614_s4 + $0x128] sm:$0xff] }
  0x9e   :  { %626 = vmatprep.subr.mxu1 %v478_v41  ;;  %556 = vmatpush1.msra.mxu0 %v475_v42  ;;  %v427_v5 = vld [vmem:[%s3614_s4 + $0xe8] sm:$0xff]  ;;  %v429_v6 = vld [vmem:[%s3614_s4 + $0xf8] sm:$0xff]  ;;  %v426_v7 = vld [vmem:[%s3614_s4 + $0xe0] sm:$0xff] }
  0x9f   :  { %627 = vmatpush1.msra.mxu1 %v477_v43  ;;  %557 = vmatprep.subr.mxu0 %v469_v44  ;;  %v428_v9 = vld [vmem:[%s3614_s4 + $0xf0] sm:$0xff]  ;;  %v414_v23 = vld [vmem:[%s3614_s4 + $0x80] sm:$0xff]  ;;  %v407_v30 = vld [vmem:[%s3614_s4 + $0x48] sm:$0xff] }
  0xa0   :  { %628 = vmatprep.subr.mxu1 %v471_v45  ;;  %558 = vmatpush1.msra.mxu0 %v468_v46  ;;  %v412_v22 = vld [vmem:[%s3614_s4 + $0x70] sm:$0xff]  ;;  %v406_v24 = vld [vmem:[%s3614_s4 + $0x40] sm:$0xff]  ;;  %v399_v31 = vld [vmem:[%s3614_s4 + $0x8] sm:$0xff] }
  0xa1   :  { %629 = vmatpush1.msra.mxu1 %v470_v47  ;;  %559 = vmatprep.subr.mxu0 %v462_v48  ;;  %v408_v26 = vld [vmem:[%s3614_s4 + $0x50] sm:$0xff]  ;;  %v401_v32 = vld [vmem:[%s3614_s4 + $0x18] sm:$0xff]  ;;  %v398_v12 = vld [vmem:[%s3614_s4] sm:$0xff] }
  0xa2   :  { %630 = vmatprep.subr.mxu1 %v464_v49  ;;  %560 = vmatpush1.msra.mxu0 %v461_v50  ;;  %v400_v34 = vld [vmem:[%s3614_s4 + $0x10] sm:$0xff] }
  0xa3   :  { %631 = vmatpush1.msra.mxu1 %v463_v51  ;;  %561 = vmatprep.subr.mxu0 %v455_v52  ;;  %v508_v35 = vld [vmem:[%s3614_s4 + $0x370] sm:$0xff] }
  0xa4   :  { %632 = vmatprep.subr.mxu1 %v457_v53  ;;  %562 = vmatpush1.msra.mxu0 %v454_v54  ;;  %v507_v54 = vld [vmem:[%s3614_s4 + $0x368] sm:$0xff] }
  0xa5   :  { %633 = vmatpush1.msra.mxu1 %v456_v55  ;;  %563 = vmatprep.subr.mxu0 %v448_v56  ;;  %v509_v55 = vld [vmem:[%s3614_s4 + $0x378] sm:$0xff] }
  0xa6   :  { %634 = vmatprep.subr.mxu1 %v450_v57  ;;  %564 = vmatpush1.msra.mxu0 %v447_v58  ;;  %v502_v57 = vld [vmem:[%s3614_s4 + $0x340] sm:$0xff] }
  0xa7   :  { %635 = vmatpush1.msra.mxu1 %v449_v59  ;;  %565 = vmatprep.subr.mxu0 %v441_v60  ;;  %v494_v58 = vld [vmem:[%s3614_s4 + $0x300] sm:$0xff]  ;;  %v493_v59 = vld [vmem:[%s3614_s4 + $0x2f8] sm:$0xff]  ;;  %v495_v60 = vld [vmem:[%s3614_s4 + $0x308] sm:$0xff] }
  0xa8   :  { %636 = vmatprep.subr.mxu1 %v443_v61  ;;  %566 = vmatpush1.msra.mxu0 %v440_v62  ;;  %v487_v61 = vld [vmem:[%s3614_s4 + $0x2c8] sm:$0xff]  ;;  %v486_v62 = vld [vmem:[%s3614_s4 + $0x2c0] sm:$0xff] }
  0xa9   :  { %637 = vmatpush1.msra.mxu1 %v442_v63  ;;  %567 = vmatprep.subr.mxu0 %v434_v1  ;;  %v488_v63 = vld [vmem:[%s3614_s4 + $0x2d0] sm:$0xff] }
  0xaa   :  { %638 = vmatprep.subr.mxu1 %v436_v2  ;;  %568 = vmatpush1.msra.mxu0 %v433_v3  ;;  %v480_v1 = vld [vmem:[%s3614_s4 + $0x290] sm:$0xff]  ;;  %v479_v2 = vld [vmem:[%s3614_s4 + $0x288] sm:$0xff]  ;;  %v481_v3 = vld [vmem:[%s3614_s4 + $0x298] sm:$0xff] }
  0xab   :  { %639 = vmatpush1.msra.mxu1 %v435_v4  ;;  %569 = vmatprep.subr.mxu0 %v427_v5  ;;  %v473_v4 = vld [vmem:[%s3614_s4 + $0x258] sm:$0xff]  ;;  %v472_v5 = vld [vmem:[%s3614_s4 + $0x250] sm:$0xff] }
  0xac   :  { %640 = vmatprep.subr.mxu1 %v429_v6  ;;  %570 = vmatpush1.msra.mxu0 %v426_v7  ;;  %v474_v6 = vld [vmem:[%s3614_s4 + $0x260] sm:$0xff] }
  0xad   :  { %641 = vmatpush1.msra.mxu1 %v428_v9  ;;  %v466_v7 = vld [vmem:[%s3614_s4 + $0x220] sm:$0xff]  ;;  %v465_v9 = vld [vmem:[%s3614_s4 + $0x218] sm:$0xff] }
 0x101   :  { %v375_v41 = vpop.permute.xlu1 %374 }
 0x152   :  { %v274_v16 = vpop.f32.mrf.mxu1 }
 0x153   :  { %v275_v17 = vadd.f32 %v274_v16, %v192_v14  ;;  %v420_v14 = vld [vmem:[%s3614_s4 + $0xb0] sm:$0xff]  ;;  %v419_v16 = vld [vmem:[%s3614_s4 + $0xa8] sm:$0xff] }
 0x154   :  { %v276_v18 = vpop.f32.mrf.mxu1  ;;  %571 = vmatprep.subr.mxu0 %v420_v14  ;;  %v467_v14 = vld [vmem:[%s3614_s4 + $0x228] sm:$0xff] }
 0x155   :  { %v2977_v19 = vmax.f32 %v275_v17, 0.0  ;;  %v277_v20 = vadd.f32 %v276_v18, %v196_v15  ;;  %v422_v15 = vld [vmem:[%s3614_s4 + $0xc0] sm:$0xff]  ;;  %v421_v17 = vld [vmem:[%s3614_s4 + $0xb8] sm:$0xff]  ;;  %572 = vmatpush1.msra.mxu0 %v419_v16 }
 0x156   :  { %v2979_v21 = vpop.f32.mrf.mxu1  ;;  %v413_v18 = vld [vmem:[%s3614_s4 + $0x78] sm:$0xff]  ;;  %642 = vmatprep.subr.mxu1 %v422_v15  ;;  %v459_v15 = vld [vmem:[%s3614_s4 + $0x1e8] sm:$0xff]  ;;  %v458_v16 = vld [vmem:[%s3614_s4 + $0x1e0] sm:$0xff] }
 0x157   :  { %v2990_v25 = vmax.f32 %v277_v20, 0.0  ;;  %361 = vrot.lane.b32.xlu1 %v2977_v19, %s2836_s0  ;;  %v415_v20 = vld [vmem:[%s3614_s4 + $0x88] sm:$0xff]  ;;  %643 = vmatpush1.msra.mxu1 %v421_v17  ;;  %v346_v33 = vadd.f32 %v2979_v21, %v200_v28  ;;  %v359_v49 = vmax.f32 %v2977_v19, %v2959_v8  ;;  %v460_v17 = vld [vmem:[%s3614_s4 + $0x1f0] sm:$0xff]  ;;  %v438_v28 = vld [vmem:[%s3614_s4 + $0x140] sm:$0xff] }
 0x158   :  { %v2467_v29 = vpop.f32.mrf.mxu1  ;;  %573 = vmatprep.subr.mxu0 %v413_v18  ;;  %644 = vmatprep.subr.mxu1 %v415_v20  ;;  %v452_v18 = vld [vmem:[%s3614_s4 + $0x1b0] sm:$0xff]  ;;  %v451_v20 = vld [vmem:[%s3614_s4 + $0x1a8] sm:$0xff] }
 0x159   :  { %378 = vrot.lane.b32.xlu0 %v2990_v25, %s2836_s0  ;;  %574 = vmatpush1.msra.mxu0 %v412_v22  ;;  %v405_v29 = vld [vmem:[%s3614_s4 + $0x38] sm:$0xff]  ;;  %v351_v37 = vmax.f32 %v346_v33, 0.0  ;;  %v424_v33 = vld [vmem:[%s3614_s4 + $0xd0] sm:$0xff] }
 0x15a   :  { %645 = vmatpush1.msra.mxu1 %v414_v23  ;;  %575 = vmatprep.subr.mxu0 %v406_v24  ;;  %v453_v22 = vld [vmem:[%s3614_s4 + $0x1b8] sm:$0xff]  ;;  %v444_v24 = vld [vmem:[%s3614_s4 + $0x170] sm:$0xff] }
 0x15b   :  { %646 = vmatprep.subr.mxu1 %v408_v26  ;;  %576 = vmatpush1.msra.mxu0 %v405_v29  ;;  %v445_v23 = vld [vmem:[%s3614_s4 + $0x178] sm:$0xff]  ;;  %v446_v26 = vld [vmem:[%s3614_s4 + $0x180] sm:$0xff] }
 0x15c   :  { %647 = vmatpush1.msra.mxu1 %v407_v30  ;;  %577 = vmatprep.subr.mxu0 %v399_v31  ;;  %v437_v29 = vld [vmem:[%s3614_s4 + $0x138] sm:$0xff]  ;;  %v439_v30 = vld [vmem:[%s3614_s4 + $0x148] sm:$0xff] }
 0x15d   :  { %370 = vrot.lane.b32.xlu0 %v2990_v25, %s2837_s21  ;;  %648 = vmatprep.subr.mxu1 %v401_v32  ;;  %v431_v31 = vld [vmem:[%s3614_s4 + $0x108] sm:$0xff]  ;;  %v430_v32 = vld [vmem:[%s3614_s4 + $0x100] sm:$0xff] }
 0x15e   :  { %578 = vmatpush1.msra.mxu0 %v398_v12  ;;  %649 = vmatpush1.msra.mxu1 %v400_v34  ;;  %v432_v12 = vld [vmem:[%s3614_s4 + $0x110] sm:$0xff]  ;;  %v423_v34 = vld [vmem:[%s3614_s4 + $0xc8] sm:$0xff] }
 0x15f   :  { %689 = vmatprep.subr.mxu0 %v508_v35  ;;  %2468 = vmatprep.subr.mxu1 %v2834_v0  ;;  %v425_v35 = vld [vmem:[%s3614_s4 + $0xd8] sm:$0xff] }
 0x161   :  { %365 = vrot.lane.b32.xlu0 %v2959_v8, %s2837_s21  ;;  %v501_v8 = vld [vmem:[%s3614_s4 + $0x338] sm:$0xff] }
 0x1c9   :  { %v362_v45 = vpop.permute.xlu1 %361 }
 0x1ca   :  { %v364_v47 = vmax.f32 %v2977_v19, %v362_v45 }
 0x1cb   :  { %v379_v36 = vpop.permute.xlu0 %378 }
 0x1cc   :  { %v381_v38 = vmax.f32 %v2990_v25, %v379_v36  ;;  %v417_v36 = vld [vmem:[%s3614_s4 + $0x98] sm:$0xff] }
 0x1cf   :  { %v371_v21 = vpop.permute.xlu0 %370 }
 0x1d0   :  { %v373_v39 = vmax.f32 %v2977_v19, %v371_v21  ;;  %v382_v40 = vmax.f32 %v381_v38, %v371_v21  ;;  %v500_v19 = vld [vmem:[%s3614_s4 + $0x330] sm:$0xff]  ;;  %v418_v38 = vld [vmem:[%s3614_s4 + $0xa0] sm:$0xff] }
 0x1d1   :  { %v410_v21 = vld [vmem:[%s3614_s4 + $0x60] sm:$0xff] }
 0x1d2   :  { %v377_v42 = vmax.f32 %v373_v39, %v375_v41  ;;  %v383_v43 = vmax.f32 %v382_v40, %v351_v37  ;;  %v416_v37 = vld [vmem:[%s3614_s4 + $0x90] sm:$0xff]  ;;  %v409_v39 = vld [vmem:[%s3614_s4 + $0x58] sm:$0xff]  ;;  %v411_v40 = vld [vmem:[%s3614_s4 + $0x68] sm:$0xff] }
 0x1d3   :  { %v366_v46 = vpop.permute.xlu0 %365  ;;  %v403_v41 = vld [vmem:[%s3614_s4 + $0x28] sm:$0xff] }
 0x1d4   :  { %v2554_v44 = vpack.i.bf16 %v383_v43, %v377_v42  ;;  %v368_v48 = vmax.f32 %v364_v47, %v366_v46  ;;  %v402_v42 = vld [vmem:[%s3614_s4 + $0x20] sm:$0xff]  ;;  %v404_v43 = vld [vmem:[%s3614_s4 + $0x30] sm:$0xff]  ;;  %s2838_s4 = smov 64  }
 0x1d5   :  { %v3371_v47 = vld [vmem:[#allocation7] sm:$0x7f] }
 0x1d6   :  { %2555 = vrot.lane.b32.xlu1 %v2554_v44, %s2836_s0  ;;  %v393_v52 = vsel %vm392_vm2, %v359_v49, %v368_v48  ;;  %v530_v44 = vsub.s32 4, %v2963_v10  ;;  %v526_v48 = vsub.s32 3, %v2963_v10  ;;  %v538_v49 = vsub.s32 6, %v2963_v10 }
 0x248   :  { %v2556_v25 = vpop.permute.xlu1 %2555 }
 0x249   :  { %v2558_v50 = vunpack.i.h.bf16 %v2556_v25  ;;  %v2557_v51 = vunpack.i.l.bf16 %v2556_v25  ;;  %v534_v25 = vsub.s32 5, %v2963_v10 }
 0x24b   :  { %v395_v53 = vsel %vm394_vm3, %v393_v52, %v2557_v51  ;;  %v531_v51 = vrot.slane %v3371_v47, %v530_v44  ;;  %v523_v52 = vrot.slane %v3371_v47, %v3166_v27 }
 0x24c   :  { %v3208_v56 = vsel %vm396_vm4, %v395_v53, %v2558_v50  ;;  %v519_v50 = vrot.slane %v3371_v47, %v2971_v13 }
 0x24d   :  { %612 = vmatmul.mubr.f32.vlgmr.msra.gmra.mxu0 %v3208_v56  ;;  %683 = vmatmul.mubr.f32.vlgmr.msra.gmra.mxu1 %v3208_v56 }
 0x24e   :  { %690 = vmatpush1.msra.mxu0 %v507_v54  ;;  %2469 = vmatpush3.msra.mxu1 %v509_v55  ;;  %v527_v55 = vrot.slane %v3371_v47, %v526_v48 }
 0x24f   :  { %691 = vmatprep.subr.mxu0 %v501_v8  ;;  %2470 = vmatprep.subr.mxu1 %v2834_v0  ;;  %v535_v8 = vrot.slane %v3371_v47, %v534_v25 }
 0x250   :  { %692 = vmatpush1.msra.mxu0 %v500_v19  ;;  %2471 = vmatpush3.msra.mxu1 %v502_v57 }
 0x251   :  { %693 = vmatprep.subr.mxu0 %v494_v58  ;;  %2472 = vmatprep.subr.mxu1 %v2834_v0 }
 0x252   :  { %694 = vmatpush1.msra.mxu0 %v493_v59  ;;  %2473 = vmatpush3.msra.mxu1 %v495_v60 }
 0x253   :  { %695 = vmatprep.subr.mxu0 %v487_v61  ;;  %2474 = vmatprep.subr.mxu1 %v2834_v0 }
 0x254   :  { %696 = vmatpush1.msra.mxu0 %v486_v62  ;;  %2475 = vmatpush3.msra.mxu1 %v488_v63 }
 0x255   :  { %697 = vmatprep.subr.mxu0 %v480_v1  ;;  %2476 = vmatprep.subr.mxu1 %v2834_v0 }
 0x256   :  { %698 = vmatpush1.msra.mxu0 %v479_v2  ;;  %2477 = vmatpush3.msra.mxu1 %v481_v3 }
 0x257   :  { %699 = vmatprep.subr.mxu0 %v473_v4  ;;  %2478 = vmatprep.subr.mxu1 %v2834_v0 }
 0x258   :  { %700 = vmatpush1.msra.mxu0 %v472_v5  ;;  %2479 = vmatpush3.msra.mxu1 %v474_v6 }
 0x259   :  { %701 = vmatprep.subr.mxu0 %v466_v7  ;;  %2480 = vmatprep.subr.mxu1 %v2834_v0 }
 0x25a   :  { %702 = vmatpush1.msra.mxu0 %v465_v9  ;;  %2481 = vmatpush3.msra.mxu1 %v467_v14 }
 0x25b   :  { %703 = vmatprep.subr.mxu0 %v459_v15  ;;  %2482 = vmatprep.subr.mxu1 %v2834_v0  ;;  %v3410_v15 = vld [vmem:[#allocation9] ss:$0 sm:$0xff] }
 0x25c   :  { %704 = vmatpush1.msra.mxu0 %v458_v16  ;;  %2483 = vmatpush3.msra.mxu1 %v460_v17 }
 0x25d   :  { %705 = vmatprep.subr.mxu0 %v452_v18  ;;  %2484 = vmatprep.subr.mxu1 %v2834_v0  ;;  %v1072_v18 = vld [vmem:[#allocation10 + $0x440] sm:$0xff] }
 0x25e   :  { %706 = vmatpush1.msra.mxu0 %v451_v20  ;;  %2485 = vmatpush3.msra.mxu1 %v453_v22  ;;  %v1071_v20 = vld [vmem:[#allocation10 + $0x438] sm:$0xff] }
 0x25f   :  { %707 = vmatprep.subr.mxu0 %v445_v23  ;;  %2486 = vmatprep.subr.mxu1 %v2834_v0  ;;  %v1063_v22 = vld [vmem:[#allocation10 + $0x3f8] sm:$0xff]  ;;  %v1062_v23 = vld [vmem:[#allocation10 + $0x3f0] sm:$0xff] }
 0x260   :  { %708 = vmatpush1.msra.mxu0 %v444_v24  ;;  %2487 = vmatpush3.msra.mxu1 %v446_v26  ;;  %v1054_v24 = vld [vmem:[#allocation10 + $0x3b0] sm:$0xff]  ;;  %v1053_v26 = vld [vmem:[#allocation10 + $0x3a8] sm:$0xff] }
 0x261   :  { %709 = vmatprep.subr.mxu0 %v438_v28  ;;  %2488 = vmatprep.subr.mxu1 %v2834_v0  ;;  %v1045_v28 = vld [vmem:[#allocation10 + $0x368] sm:$0xff] }
 0x262   :  { %710 = vmatpush1.msra.mxu0 %v437_v29  ;;  %2489 = vmatpush3.msra.mxu1 %v439_v30  ;;  %v1044_v29 = vld [vmem:[#allocation10 + $0x360] sm:$0xff] }
 0x263   :  { %711 = vmatprep.subr.mxu0 %v431_v31  ;;  %2490 = vmatprep.subr.mxu1 %v2834_v0  ;;  %v1036_v30 = vld [vmem:[#allocation10 + $0x320] sm:$0xff]  ;;  %v1035_v31 = vld [vmem:[#allocation10 + $0x318] sm:$0xff] }
 0x264   :  { %712 = vmatpush1.msra.mxu0 %v430_v32  ;;  %2491 = vmatpush3.msra.mxu1 %v432_v12  ;;  %v1027_v32 = vld [vmem:[#allocation10 + $0x2d8] sm:$0xff]  ;;  %v1026_v12 = vld [vmem:[#allocation10 + $0x2d0] sm:$0xff] }
 0x265   :  { %713 = vmatprep.subr.mxu0 %v424_v33  ;;  %2492 = vmatprep.subr.mxu1 %v2834_v0  ;;  %v1018_v33 = vld [vmem:[#allocation10 + $0x290] sm:$0xff] }
 0x266   :  { %714 = vmatpush1.msra.mxu0 %v423_v34  ;;  %2493 = vmatpush3.msra.mxu1 %v425_v35  ;;  %v1017_v34 = vld [vmem:[#allocation10 + $0x288] sm:$0xff] }
 0x267   :  { %715 = vmatprep.subr.mxu0 %v417_v36  ;;  %2494 = vmatprep.subr.mxu1 %v2834_v0  ;;  %v1009_v35 = vld [vmem:[#allocation10 + $0x248] sm:$0xff]  ;;  %v1008_v36 = vld [vmem:[#allocation10 + $0x240] sm:$0xff] }
 0x268   :  { %716 = vmatpush1.msra.mxu0 %v416_v37  ;;  %2495 = vmatpush3.msra.mxu1 %v418_v38  ;;  %v1252_v37 = vld [vmem:[#allocation10 + $0x9e0] sm:$0xff] }
 0x269   :  { %717 = vmatprep.subr.mxu0 %v410_v21  ;;  %2496 = vmatprep.subr.mxu1 %v2834_v0  ;;  %v1000_v38 = vld [vmem:[#allocation10 + $0x200] sm:$0xff]  ;;  %v1251_v21 = vld [vmem:[#allocation10 + $0x9d8] sm:$0xff] }
 0x26a   :  { %718 = vmatpush1.msra.mxu0 %v409_v39  ;;  %2497 = vmatpush3.msra.mxu1 %v411_v40  ;;  %v1243_v39 = vld [vmem:[#allocation10 + $0x998] sm:$0xff] }
 0x26b   :  { %719 = vmatprep.subr.mxu0 %v403_v41  ;;  %2498 = vmatprep.subr.mxu1 %v2834_v0  ;;  %v999_v40 = vld [vmem:[#allocation10 + $0x1f8] sm:$0xff]  ;;  %v1242_v41 = vld [vmem:[#allocation10 + $0x990] sm:$0xff] }
 0x26c   :  { %720 = vmatpush1.msra.mxu0 %v402_v42  ;;  %753 = vmatprep.mubr.f32.mxu0 %v2834_v0  ;;  %v991_v42 = vld [vmem:[#allocation10 + $0x1b8] sm:$0xff] }
 0x26d   :  { %2499 = vmatpush3.msra.mxu1 %v404_v43  ;;  %2500 = vmatprep.mubr.msk.f32.mxu1 %vm2835_vm1, %v2834_v0  ;;  %v1234_v43 = vld [vmem:[#allocation10 + $0x950] sm:$0xff] }
 0x26e   :  { %754 = vmatmul.mubr.f32.vlgmr.msra.gmra.mxu0 %v3208_v56  ;;  %2501 = vmatmul.mubr.f32.vlgmr.msra.gmra.mxu1 %v3208_v56  ;;  %v539_v56 = vrot.slane %v3371_v47, %v538_v49 }
 0x26f   :  { %1446 = vmatprep.mubr.f32.mxu1 %v2834_v0  ;;  %1311 = vmatprep.subr.mxu0 %v1072_v18  ;;  %v1197_v18 = vld [vmem:[#allocation10 + $0x828] sm:$0xff] }
 0x270   :  { %1312 = vmatpush1.msra.mxu0 %v1071_v20  ;;  %1406 = vmatprep.subr.mxu1 %v1252_v37  ;;  %v1189_v20 = vld [vmem:[#allocation10 + $0x7e8] sm:$0xff] }
 0x271   :  { %1313 = vmatprep.subr.mxu0 %v1063_v22  ;;  %1407 = vmatpush1.msra.mxu1 %v1251_v21  ;;  %v1188_v22 = vld [vmem:[#allocation10 + $0x7e0] sm:$0xff]  ;;  %v1125_v37 = vld [vmem:[#allocation10 + $0x5e8] sm:$0xff] }
 0x272   :  { %1314 = vmatpush1.msra.mxu0 %v1062_v23  ;;  %1408 = vmatprep.subr.mxu1 %v1243_v39  ;;  %v1180_v23 = vld [vmem:[#allocation10 + $0x7a0] sm:$0xff]  ;;  %v1117_v21 = vld [vmem:[#allocation10 + $0x5a8] sm:$0xff] }
 0x273   :  { %1315 = vmatprep.subr.mxu0 %v1054_v24  ;;  %1409 = vmatpush1.msra.mxu1 %v1242_v41  ;;  %v1179_v24 = vld [vmem:[#allocation10 + $0x798] sm:$0xff]  ;;  %v515_v41 = vrot.slane %v3371_v47, %v2966_v11  ;;  %v1089_v47 = vld [vmem:[#allocation10 + $0x4c8] sm:$0xff] }
 0x274   :  { %1316 = vmatpush1.msra.mxu0 %v1053_v26  ;;  %1410 = vmatprep.subr.mxu1 %v1234_v43  ;;  %v1171_v26 = vld [vmem:[#allocation10 + $0x758] sm:$0xff]  ;;  %v1108_v43 = vld [vmem:[#allocation10 + $0x560] sm:$0xff] }
 0x275   :  { %1317 = vmatprep.subr.mxu0 %v1045_v28  ;;  %v1170_v28 = vld [vmem:[#allocation10 + $0x750] sm:$0xff] }
 0x276   :  { %1318 = vmatpush1.msra.mxu0 %v1044_v29  ;;  %v1162_v29 = vld [vmem:[#allocation10 + $0x710] sm:$0xff] }
 0x277   :  { %1319 = vmatprep.subr.mxu0 %v1036_v30  ;;  %v1161_v30 = vld [vmem:[#allocation10 + $0x708] sm:$0xff] }
 0x278   :  { %1320 = vmatpush1.msra.mxu0 %v1035_v31  ;;  %v1153_v31 = vld [vmem:[#allocation10 + $0x6c8] sm:$0xff] }
 0x279   :  { %1321 = vmatprep.subr.mxu0 %v1027_v32  ;;  %v1152_v32 = vld [vmem:[#allocation10 + $0x6c0] sm:$0xff] }
 0x27a   :  { %1322 = vmatpush1.msra.mxu0 %v1026_v12  ;;  %v1144_v12 = vld [vmem:[#allocation10 + $0x680] sm:$0xff] }
 0x27b   :  { %1323 = vmatprep.subr.mxu0 %v1018_v33  ;;  %v1143_v33 = vld [vmem:[#allocation10 + $0x678] sm:$0xff] }
 0x27c   :  { %1324 = vmatpush1.msra.mxu0 %v1017_v34  ;;  %v1135_v34 = vld [vmem:[#allocation10 + $0x638] sm:$0xff] }
 0x27d   :  { %1325 = vmatprep.subr.mxu0 %v1009_v35  ;;  %v1134_v35 = vld [vmem:[#allocation10 + $0x630] sm:$0xff] }
 0x27e   :  { %1326 = vmatpush1.msra.mxu0 %v1008_v36  ;;  %v1126_v36 = vld [vmem:[#allocation10 + $0x5f0] sm:$0xff] }
 0x27f   :  { %1327 = vmatprep.subr.mxu0 %v1000_v38 }
 0x280   :  { %1328 = vmatpush1.msra.mxu0 %v999_v40  ;;  %v1116_v40 = vld [vmem:[#allocation10 + $0x5a0] sm:$0xff] }
 0x281   :  { %1329 = vmatprep.subr.mxu0 %v991_v42 }
 0x30d   :  { %v3369_v45 = vpop.f32.mrf.mxu0  ;;  %v684_v46 = vpop.f32.mrf.mxu1 }
 0x30e   :  { %v3394_v60 = vadd.f32 %v684_v46, %v523_v52  ;;  %v1233_v46 = vld [vmem:[#allocation10 + $0x948] sm:$0xff]  ;;  %v982_v52 = vld [vmem:[#allocation10 + $0x170] sm:$0xff] }
 0x30f   :  { %v615_v53 = vpop.f32.mrf.mxu0  ;;  %v686_v54 = vpop.f32.mrf.mxu1  ;;  %1411 = vmatpush1.msra.mxu1 %v1233_v46 }
 0x310   :  { %v616_v58 = vadd.f32 %v615_v53, %v519_v50  ;;  %v687_v63 = vadd.f32 %v686_v54, %v527_v55  ;;  %v832_v6 = vmax.f32 %v3394_v60, 0.0  ;;  %v990_v50 = vld [vmem:[#allocation10 + $0x1b0] sm:$0xff]  ;;  %v1224_v53 = vld [vmem:[#allocation10 + $0x900] sm:$0xff]  ;;  %v981_v54 = vld [vmem:[#allocation10 + $0x168] sm:$0xff] }
 0x311   :  { %v1074_v55 = vld [vmem:[#allocation10 + $0x450] sm:$0xff]  ;;  %1330 = vmatpush1.msra.mxu0 %v990_v50  ;;  %v1107_v50 = vld [vmem:[#allocation10 + $0x558] sm:$0xff] }
 0x312   :  { %v3397_v4 = vmax.f32 %v616_v58, 0.0  ;;  %v3403_v7 = vmax.f32 %v687_v63, 0.0  ;;  %1331 = vmatprep.subr.mxu0 %v982_v52  ;;  %v955_v58 = vld [vmem:[#allocation10 + $0x98] sm:$0xff]  ;;  %v945_v63 = vld [vmem:[#allocation10 + $0x48] sm:$0xff] }
 0x313   :  { %1332 = vmatpush1.msra.mxu0 %v981_v54  ;;  %v1099_v52 = vld [vmem:[#allocation10 + $0x518] sm:$0xff]  ;;  %v1098_v54 = vld [vmem:[#allocation10 + $0x510] sm:$0xff] }
 0x314   :  { %v2559_v14 = vpack.i.bf16 %v832_v6, %v3397_v4  ;;  %v2564_v16 = vpack.i.bf16 %v3410_v15, %v3403_v7 }
 0x32e   :  { %v755_v19 = vpop.f32.mrf.mxu0  ;;  %v826_v57 = vpop.f32.mrf.mxu1 }
 0x32f   :  { %v3392_v59 = vadd.f32 %v755_v19, %v531_v51  ;;  %v827_v2 = vadd.f32 %v826_v57, %v539_v56  ;;  %v1225_v51 = vld [vmem:[#allocation10 + $0x908] sm:$0xff]  ;;  %v964_v19 = vld [vmem:[#allocation10 + $0xe0] sm:$0xff]  ;;  %v963_v57 = vld [vmem:[#allocation10 + $0xd8] sm:$0xff] }
 0x330   :  { %v757_v61 = vpop.f32.mrf.mxu0  ;;  %v2502_v62 = vpop.f32.mrf.mxu1  ;;  %v973_v56 = vld [vmem:[#allocation10 + $0x128] sm:$0xff]  ;;  %1412 = vmatprep.subr.mxu1 %v1225_v51 }
 0x331   :  { %v834_v1 = vmax.f32 %v3392_v59, 0.0  ;;  %v758_v3 = vadd.f32 %v757_v61, %v535_v8  ;;  %v836_v9 = vmax.f32 %v827_v2, 0.0  ;;  %v972_v8 = vld [vmem:[#allocation10 + $0x120] sm:$0xff]  ;;  %1413 = vmatpush1.msra.mxu1 %v1224_v53  ;;  %1333 = vmatprep.subr.mxu0 %v973_v56  ;;  %v954_v61 = vld [vmem:[#allocation10 + $0x90] sm:$0xff]  ;;  %v937_v2 = vld [vmem:[#allocation10 + $0x8] sm:$0xff]  ;;  %v614_v59 = vadd.f32 %v3369_v45, %v515_v41 }
 0x332   :  { %1453 = vmatprep.subr.mxu1 %v1074_v55  ;;  %1334 = vmatpush1.msra.mxu0 %v972_v8  ;;  %v946_v62 = vld [vmem:[#allocation10 + $0x50] sm:$0xff]  ;;  %v1080_v45 = vld [vmem:[#allocation10 + $0x480] sm:$0xff] }
 0x333   :  { %v835_v5 = vmax.f32 %v758_v3, 0.0  ;;  %889 = vrot.lane.b32.xlu0 %v834_v1, %s2836_s0  ;;  %1335 = vmatprep.subr.mxu0 %v964_v19  ;;  %v936_v3 = vld [vmem:[#allocation10] sm:$0xff]  ;;  %v1090_v55 = vld [vmem:[#allocation10 + $0x4d0] sm:$0xff] }
 0x334   :  { %1336 = vmatpush1.msra.mxu0 %v963_v57  ;;  %v1081_v57 = vld [vmem:[#allocation10 + $0x488] sm:$0xff] }
 0x335   :  { %883 = vrot.lane.b32.xlu1 %v835_v5, %s2836_s0  ;;  %v2569_v17 = vpack.i.bf16 %v835_v5, %v3403_v7  ;;  %1337 = vmatprep.subr.mxu0 %v955_v58  ;;  %v1216_v5 = vld [vmem:[#allocation10 + $0x8c0] sm:$0xff] }
 0x336   :  { %1338 = vmatpush1.msra.mxu0 %v954_v61 }
 0x337   :  { %899 = vrot.lane.b32.xlu0 %v836_v9, %s2838_s4  ;;  %1339 = vmatprep.subr.mxu0 %v946_v62  ;;  %v1215_v9 = vld [vmem:[#allocation10 + $0x8b8] sm:$0xff] }
 0x338   :  { %1340 = vmatpush1.msra.mxu0 %v945_v63 }
 0x339   :  { %2560 = vrot.lane.b32.xlu1 %v2559_v14, %s2836_s0  ;;  %1341 = vmatprep.subr.mxu0 %v937_v2  ;;  %v1207_v14 = vld [vmem:[#allocation10 + $0x878] sm:$0xff]  ;;  %v3428_v2 = vmax.f32 %v614_v59, 0.0 }
 0x33a   :  { %1342 = vmatpush1.msra.mxu0 %v936_v3 }
 0x33b   :  { %2565 = vrot.lane.b32.xlu0 %v2564_v16, %s2836_s0  ;;  %1343 = vmatprep.subr.mxu0 %v1216_v5  ;;  %v1206_v16 = vld [vmem:[#allocation10 + $0x870] sm:$0xff]  ;;  %v844_v59 = vmax.f32 %v3428_v2, %v3410_v15 }
 0x33c   :  { %1344 = vmatpush2.msra.mxu0 %v1215_v9 }
 0x33d   :  { %2570 = vrot.lane.b32.xlu1 %v2569_v17, %s2838_s4  ;;  %v1198_v17 = vld [vmem:[#allocation10 + $0x830] sm:$0xff]  ;;  %1345 = vmatprep.subr.mxu0 %v1207_v14 }
 0x33e   :  { %1346 = vmatpush2.msra.mxu0 %v1206_v16 }
 0x33f   :  { %850 = vrot.lane.b32.xlu0 %v3410_v15, %s2837_s21  ;;  %1347 = vmatprep.subr.mxu0 %v1198_v17  ;;  %v1254_v17 = vld [vmem:[#allocation10 + $0x9f0] sm:$0xff] }
 0x340   :  { %1348 = vmatpush2.msra.mxu0 %v1197_v18 }
 0x341   :  { %1349 = vmatprep.subr.mxu0 %v1189_v20 }
 0x342   :  { %1350 = vmatpush2.msra.mxu0 %v1188_v22 }
 0x343   :  { %1351 = vmatprep.subr.mxu0 %v1180_v23 }
 0x344   :  { %1352 = vmatpush2.msra.mxu0 %v1179_v24 }
 0x345   :  { %1353 = vmatprep.subr.mxu0 %v1171_v26 }
 0x346   :  { %1354 = vmatpush2.msra.mxu0 %v1170_v28 }
 0x347   :  { %1355 = vmatprep.subr.mxu0 %v1162_v29 }
 0x348   :  { %1356 = vmatpush2.msra.mxu0 %v1161_v30 }
 0x349   :  { %1357 = vmatprep.subr.mxu0 %v1153_v31  ;;  %v2388_v31 = vld [vmem:[#allocation13] ss:$0 sm:$0xff] }
 0x34a   :  { %1358 = vmatpush2.msra.mxu0 %v1152_v32  ;;  %v1073_v32 = vld [vmem:[#allocation10 + $0x448] sm:$0xff] }
 0x34b   :  { %1359 = vmatprep.subr.mxu0 %v1144_v12 }
 0x34c   :  { %1360 = vmatpush2.msra.mxu0 %v1143_v33  ;;  %v1065_v33 = vld [vmem:[#allocation10 + $0x408] sm:$0xff] }
 0x34d   :  { %1361 = vmatprep.subr.mxu0 %v1135_v34  ;;  %v1056_v34 = vld [vmem:[#allocation10 + $0x3c0] sm:$0xff] }
 0x34e   :  { %1362 = vmatpush2.msra.mxu0 %v1134_v35  ;;  %v1055_v35 = vld [vmem:[#allocation10 + $0x3b8] sm:$0xff] }
 0x34f   :  { %1363 = vmatprep.subr.mxu0 %v1126_v36  ;;  %v1047_v36 = vld [vmem:[#allocation10 + $0x378] sm:$0xff] }
 0x350   :  { %1364 = vmatpush2.msra.mxu0 %v1125_v37  ;;  %v1046_v37 = vld [vmem:[#allocation10 + $0x370] sm:$0xff] }
 0x351   :  { %1365 = vmatprep.subr.mxu0 %v1117_v21  ;;  %v1037_v21 = vld [vmem:[#allocation10 + $0x328] sm:$0xff] }
 0x352   :  { %1366 = vmatpush2.msra.mxu0 %v1116_v40  ;;  %v1029_v40 = vld [vmem:[#allocation10 + $0x2e8] sm:$0xff] }
 0x353   :  { %1367 = vmatprep.subr.mxu0 %v1108_v43  ;;  %v1028_v43 = vld [vmem:[#allocation10 + $0x2e0] sm:$0xff] }
 0x354   :  { %1368 = vmatpush2.msra.mxu0 %v1107_v50 }
 0x355   :  { %1369 = vmatprep.subr.mxu0 %v1099_v52 }
 0x356   :  { %1370 = vmatpush2.msra.mxu0 %v1098_v54  ;;  %v1011_v54 = vld [vmem:[#allocation10 + $0x258] sm:$0xff] }
 0x357   :  { %1371 = vmatprep.subr.mxu0 %v1090_v55 }
 0x358   :  { %1372 = vmatpush2.msra.mxu0 %v1089_v47 }
 0x359   :  { %1373 = vmatprep.subr.mxu0 %v1081_v57 }
 0x35a   :  { %1374 = vmatpush2.msra.mxu0 %v1080_v45 }
 0x35b   :  { %1548 = vmatprep.subr.mxu0 %v1254_v17  ;;  %v1244_v17 = vld [vmem:[#allocation10 + $0x9a0] sm:$0xff] }
 0x3a5   :  { %v890_v38 = vpop.permute.xlu0 %889 }
 0x3a6   :  { %v892_v39 = vmax.f32 %v834_v1, %v890_v38  ;;  %v1038_v38 = vld [vmem:[#allocation10 + $0x330] sm:$0xff] }
 0x3a7   :  { %v884_v42 = vpop.permute.xlu1 %883 }
 0x3a8   :  { %v893_v46 = vmax.f32 %v892_v39, %v884_v42  ;;  %v886_v58 = vmax.f32 %v3403_v7, %v884_v42 }
 0x3a9   :  { %v900_v51 = vpop.permute.xlu0 %899 }
 0x3aa   :  { %v902_v53 = vmax.f32 %v893_v46, %v900_v51  ;;  %v1019_v51 = vld [vmem:[#allocation10 + $0x298] sm:$0xff] }
 0x3ab   :  { %v2561_v1 = vpop.permute.xlu1 %2560 }
 0x3ac   :  { %v2563_v56 = vunpack.i.h.bf16 %v2561_v1  ;;  %v2562_v8 = vunpack.i.l.bf16 %v2561_v1  ;;  %928 = vrot.lane.b32.xlu1 %v902_v53, %s2838_s4 }
 0x3ad   :  { %v2566_v19 = vpop.permute.xlu0 %2565 }
 0x3ae   :  { %v869_v61 = vmax.f32 %v3397_v4, %v2562_v8  ;;  %v2568_v62 = vunpack.i.h.bf16 %v2566_v19  ;;  %v2567_v63 = vunpack.i.l.bf16 %v2566_v19  ;;  %v876_v3 = vmax.f32 %v832_v6, %v2563_v56 }
 0x3af   :  { %v2571_v5 = vpop.permute.xlu1 %2570  ;;  %v858_v18 = vmax.f32 %v3428_v2, %v2562_v8  ;;  %v867_v29 = vmax.f32 %v3397_v4, %v2563_v56  ;;  %v1064_v4 = vld [vmem:[#allocation10 + $0x400] sm:$0xff]  ;;  %v1010_v8 = vld [vmem:[#allocation10 + $0x250] sm:$0xff] }
 0x3b0   :  { %v887_v9 = vmax.f32 %v886_v58, %v2568_v62  ;;  %v2573_v14 = vunpack.i.h.bf16 %v2571_v5  ;;  %v2572_v16 = vunpack.i.l.bf16 %v2571_v5  ;;  %v870_v7 = vmax.f32 %v869_v61, %v2563_v56  ;;  %v1002_v58 = vld [vmem:[#allocation10 + $0x210] sm:$0xff]  ;;  %v1253_v5 = vld [vmem:[#allocation10 + $0x9e8] sm:$0xff] }
 0x3b1   :  { %v880_v20 = vmax.f32 %v876_v3, %v2567_v63  ;;  %v862_v26 = vmax.f32 %v858_v18, %v2568_v62  ;;  %v851_v6 = vpop.permute.xlu0 %850  ;;  %v1001_v62 = vld [vmem:[#allocation10 + $0x208] sm:$0xff]  ;;  %v983_v18 = vld [vmem:[#allocation10 + $0x178] sm:$0xff] }
 0x3b2   :  { %v2574_v22 = vpack.i.bf16 %v887_v9, %v3428_v2  ;;  %v897_v23 = vmax.f32 %v893_v46, %v2573_v14  ;;  %v875_v24 = vmax.f32 %v870_v7, %v2572_v16  ;;  %v868_v30 = vmax.f32 %v867_v29, %v851_v6  ;;  %v1020_v46 = vld [vmem:[#allocation10 + $0x2a0] sm:$0xff]  ;;  %v1245_v14 = vld [vmem:[#allocation10 + $0x9a8] sm:$0xff] }
 0x3b3   :  { %v881_v60 = vmax.f32 %v880_v20, %v2572_v16  ;;  %v992_v9 = vld [vmem:[#allocation10 + $0x1c0] sm:$0xff]  ;;  %v975_v20 = vld [vmem:[#allocation10 + $0x138] sm:$0xff]  ;;  %v957_v29 = vld [vmem:[#allocation10 + $0xa8] sm:$0xff] }
 0x3b4   :  { %2575 = vrot.lane.b32.xlu0 %v2574_v22, %s2836_s0  ;;  %912 = vrot.lane.b32.xlu1 %v875_v24, %s2838_s4  ;;  %v2579_v28 = vpack.i.bf16 %v897_v23, %v862_v26  ;;  %v984_v16 = vld [vmem:[#allocation10 + $0x180] sm:$0xff]  ;;  %v1235_v22 = vld [vmem:[#allocation10 + $0x958] sm:$0xff]  ;;  %v974_v23 = vld [vmem:[#allocation10 + $0x130] sm:$0xff] }
 0x3b5   :  { %v1236_v7 = vld [vmem:[#allocation10 + $0x960] sm:$0xff]  ;;  %v1227_v24 = vld [vmem:[#allocation10 + $0x918] sm:$0xff]  ;;  %v966_v26 = vld [vmem:[#allocation10 + $0xf0] sm:$0xff] }
 0x3b8   :  { %916 = vrot.lane.b32.xlu0 %v881_v60, %s2837_s21  ;;  %2580 = vrot.lane.b32.xlu1 %v2579_v28, %s2836_s0  ;;  %v1226_v60 = vld [vmem:[#allocation10 + $0x910] sm:$0xff]  ;;  %v1076_v28 = vld [vmem:[#allocation10 + $0x460] sm:$0xff] }
 0x3bc   :  { %908 = vrot.lane.b32.xlu0 %v868_v30, %s2838_s4  ;;  %2060 = vrot.lane.b32.xlu1 %v2388_v31, %s2838_s4  ;;  %v1075_v30 = vld [vmem:[#allocation10 + $0x458] sm:$0xff] }
 0x3c0   :  { %2041 = vrot.lane.b32.xlu0 %v2388_v31, %s2837_s21 }
 0x3c4   :  { %2050 = vrot.lane.b32.xlu0 %v2388_v31, %s2836_s0  ;;  %v956_v31 = vld [vmem:[#allocation10 + $0xa0] sm:$0xff] }
 0x41e   :  { %v3443_v12 = vpop.permute.xlu1 %928 }
 0x41f   :  { %2383 = vmatmul.mubr.msk.f32.vlgmr.msra.gmra.mxu1 %vm392_vm2, %v3443_v12 }
 0x420   :  { %1454 = vmatpush1.msra.mxu1 %v1073_v32  ;;  %v1067_v32 = vld [vmem:[#allocation10 + $0x418] sm:$0xff] }
 0x421   :  { %1455 = vmatprep.subr.mxu1 %v1065_v33  ;;  %v948_v33 = vld [vmem:[#allocation10 + $0x60] sm:$0xff] }
 0x422   :  { %1456 = vmatpush1.msra.mxu1 %v1064_v4  ;;  %v1066_v4 = vld [vmem:[#allocation10 + $0x410] sm:$0xff] }
 0x423   :  { %1457 = vmatprep.subr.mxu1 %v1056_v34  ;;  %v947_v34 = vld [vmem:[#allocation10 + $0x58] sm:$0xff] }
 0x424   :  { %1458 = vmatpush1.msra.mxu1 %v1055_v35  ;;  %v1058_v35 = vld [vmem:[#allocation10 + $0x3d0] sm:$0xff] }
 0x425   :  { %1459 = vmatprep.subr.mxu1 %v1047_v36  ;;  %v939_v36 = vld [vmem:[#allocation10 + $0x18] sm:$0xff] }
 0x426   :  { %1460 = vmatpush1.msra.mxu1 %v1046_v37  ;;  %v2576_v39 = vpop.permute.xlu0 %2575  ;;  %v913_v41 = vpop.permute.xlu1 %912  ;;  %v1057_v37 = vld [vmem:[#allocation10 + $0x3c8] sm:$0xff] }
 0x427   :  { %1461 = vmatprep.subr.mxu1 %v1038_v38  ;;  %v2577_v42 = vunpack.i.l.bf16 %v2576_v39  ;;  %v2578_v52 = vunpack.i.h.bf16 %v2576_v39  ;;  %v938_v38 = vld [vmem:[#allocation10 + $0x10] sm:$0xff] }
 0x428   :  { %1462 = vmatpush1.msra.mxu1 %v1037_v21  ;;  %v1049_v21 = vld [vmem:[#allocation10 + $0x388] sm:$0xff]  ;;  %v1218_v39 = vld [vmem:[#allocation10 + $0x8d0] sm:$0xff] }
 0x429   :  { %v849_v50 = vmax.f32 %v3428_v2, %v2577_v42  ;;  %1463 = vmatprep.subr.mxu1 %v1029_v40  ;;  %v993_v2 = vld [vmem:[#allocation10 + $0x1c8] sm:$0xff]  ;;  %v1048_v40 = vld [vmem:[#allocation10 + $0x380] sm:$0xff] }
 0x42a   :  { %1464 = vmatpush1.msra.mxu1 %v1028_v43  ;;  %v917_v53 = vpop.permute.xlu0 %916  ;;  %v2581_v56 = vpop.permute.xlu1 %2580  ;;  %v1040_v42 = vld [vmem:[#allocation10 + $0x340] sm:$0xff]  ;;  %v1209_v43 = vld [vmem:[#allocation10 + $0x888] sm:$0xff] }
 0x42b   :  { %v853_v1 = vmax.f32 %v849_v50, %v851_v6  ;;  %1465 = vmatprep.subr.mxu1 %v1020_v46  ;;  %v933_v55 = vsel %vm392_vm2, %v913_v41, %v917_v53  ;;  %v2583_v19 = vunpack.i.h.bf16 %v2581_v56  ;;  %v2582_v57 = vunpack.i.l.bf16 %v2581_v56  ;;  %v965_v6 = vld [vmem:[#allocation10 + $0xe8] sm:$0xff]  ;;  %v1039_v46 = vld [vmem:[#allocation10 + $0x338] sm:$0xff]  ;;  %v1208_v50 = vld [vmem:[#allocation10 + $0x880] sm:$0xff] }
 0x42c   :  { %v934_v47 = vsel %vm394_vm3, %v933_v55, %v2578_v52  ;;  %1466 = vmatpush1.msra.mxu1 %v1019_v51  ;;  %v1217_v41 = vld [vmem:[#allocation10 + $0x8c8] sm:$0xff]  ;;  %v1031_v51 = vld [vmem:[#allocation10 + $0x2f8] sm:$0xff]  ;;  %v1200_v52 = vld [vmem:[#allocation10 + $0x840] sm:$0xff] }
 0x42d   :  { %1467 = vmatprep.subr.mxu1 %v1011_v54  ;;  %v930_v61 = vsel %vm392_vm2, %v844_v59, %v853_v1  ;;  %v3455_v45 = vsel %vm396_vm4, %v934_v47, %v2583_v19  ;;  %v1030_v53 = vld [vmem:[#allocation10 + $0x2f0] sm:$0xff]  ;;  %v1199_v54 = vld [vmem:[#allocation10 + $0x838] sm:$0xff]  ;;  %v1021_v55 = vld [vmem:[#allocation10 + $0x2a8] sm:$0xff] }
 0x42e   :  { %1468 = vmatpush1.msra.mxu1 %v1010_v8  ;;  %v909_v63 = vpop.permute.xlu0 %908  ;;  %v931_v15 = vsel %vm394_vm3, %v930_v61, %v2582_v57  ;;  %1375 = vmatprep.mubr.f32.mxu0 %v3455_v45  ;;  %v1022_v59 = vld [vmem:[#allocation10 + $0x2b0] sm:$0xff]  ;;  %v1191_v1 = vld [vmem:[#allocation10 + $0x7f8] sm:$0xff]  ;;  %v1013_v8 = vld [vmem:[#allocation10 + $0x268] sm:$0xff] }
 0x42f   :  { %1469 = vmatprep.subr.mxu1 %v1002_v58  ;;  %v3458_v3 = vsel %vm396_vm4, %v931_v15, %v909_v63  ;;  %1517 = vmatprep.mubr.f32.mxu1 %v3455_v45  ;;  %v1190_v56 = vld [vmem:[#allocation10 + $0x7f0] sm:$0xff]  ;;  %v1012_v19 = vld [vmem:[#allocation10 + $0x260] sm:$0xff]  ;;  %v1181_v57 = vld [vmem:[#allocation10 + $0x7a8] sm:$0xff] }
 0x430   :  { %1470 = vmatpush1.msra.mxu1 %v1001_v62  ;;  %1376 = vmatmul.mubr.f32.vlgmr.msra.gmra.mxu0 %v3458_v3  ;;  %v1182_v47 = vld [vmem:[#allocation10 + $0x7b0] sm:$0xff]  ;;  %v1004_v58 = vld [vmem:[#allocation10 + $0x220] sm:$0xff]  ;;  %v1173_v61 = vld [vmem:[#allocation10 + $0x768] sm:$0xff] }
 0x431   :  { %1471 = vmatprep.subr.mxu1 %v993_v2  ;;  %1549 = vmatpush1.msra.mxu0 %v1253_v5  ;;  %v1003_v62 = vld [vmem:[#allocation10 + $0x218] sm:$0xff]  ;;  %v1172_v63 = vld [vmem:[#allocation10 + $0x760] sm:$0xff]  ;;  %v994_v5 = vld [vmem:[#allocation10 + $0x1d0] sm:$0xff] }
 0x432   :  { %1472 = vmatpush1.msra.mxu1 %v992_v9  ;;  %1550 = vmatprep.subr.mxu0 %v1245_v14  ;;  %v995_v15 = vld [vmem:[#allocation10 + $0x1d8] sm:$0xff]  ;;  %v1164_v2 = vld [vmem:[#allocation10 + $0x720] sm:$0xff]  ;;  %v986_v14 = vld [vmem:[#allocation10 + $0x190] sm:$0xff] }
 0x433   :  { %1473 = vmatprep.subr.mxu1 %v984_v16  ;;  %1551 = vmatpush1.msra.mxu0 %v1244_v17  ;;  %v1163_v9 = vld [vmem:[#allocation10 + $0x718] sm:$0xff]  ;;  %v985_v17 = vld [vmem:[#allocation10 + $0x188] sm:$0xff] }
 0x434   :  { %1474 = vmatpush1.msra.mxu1 %v983_v18  ;;  %1552 = vmatprep.subr.mxu0 %v1236_v7  ;;  %v1155_v16 = vld [vmem:[#allocation10 + $0x6d8] sm:$0xff]  ;;  %v1154_v18 = vld [vmem:[#allocation10 + $0x6d0] sm:$0xff]  ;;  %v977_v7 = vld [vmem:[#allocation10 + $0x148] sm:$0xff] }
 0x435   :  { %1475 = vmatprep.subr.mxu1 %v975_v20  ;;  %1553 = vmatpush1.msra.mxu0 %v1235_v22  ;;  %v1146_v20 = vld [vmem:[#allocation10 + $0x690] sm:$0xff]  ;;  %v976_v22 = vld [vmem:[#allocation10 + $0x140] sm:$0xff] }
 0x436   :  { %1476 = vmatpush1.msra.mxu1 %v974_v23  ;;  %1554 = vmatprep.subr.mxu0 %v1227_v24  ;;  %v1145_v23 = vld [vmem:[#allocation10 + $0x688] sm:$0xff]  ;;  %v968_v24 = vld [vmem:[#allocation10 + $0x100] sm:$0xff] }
 0x437   :  { %1477 = vmatprep.subr.mxu1 %v966_v26  ;;  %1555 = vmatpush1.msra.mxu0 %v1226_v60  ;;  %v1137_v26 = vld [vmem:[#allocation10 + $0x648] sm:$0xff]  ;;  %v967_v60 = vld [vmem:[#allocation10 + $0xf8] sm:$0xff] }
 0x438   :  { %1588 = vmatprep.mubr.f32.mxu0 %v2834_v0  ;;  %1478 = vmatpush1.msra.mxu1 %v965_v6  ;;  %v1136_v6 = vld [vmem:[#allocation10 + $0x640] sm:$0xff] }
 0x439   :  { %2384 = vmatmul.mubr.msk.f32.vlgmr.msra.gmra.mxu0 %vm392_vm2, %v3443_v12  ;;  %1595 = vmatprep.subr.mxu0 %v1076_v28  ;;  %v959_v28 = vld [vmem:[#allocation10 + $0xb8] sm:$0xff] }
 0x43a   :  { %1479 = vmatprep.subr.mxu1 %v957_v29  ;;  %1596 = vmatpush1.msra.mxu0 %v1075_v30  ;;  %v1128_v29 = vld [vmem:[#allocation10 + $0x600] sm:$0xff]  ;;  %v958_v30 = vld [vmem:[#allocation10 + $0xb0] sm:$0xff] }
 0x43b   :  { %1659 = vmatprep.mubr.f32.mxu0 %v3455_v45  ;;  %1480 = vmatpush1.msra.mxu1 %v956_v31  ;;  %v1127_v31 = vld [vmem:[#allocation10 + $0x5f8] sm:$0xff] }
 0x43c   :  { %1597 = vmatprep.subr.mxu0 %v1067_v32  ;;  %1481 = vmatprep.subr.mxu1 %v948_v33  ;;  %v950_v32 = vld [vmem:[#allocation10 + $0x70] sm:$0xff]  ;;  %v1119_v33 = vld [vmem:[#allocation10 + $0x5b8] sm:$0xff] }
 0x43d   :  { %1598 = vmatpush1.msra.mxu0 %v1066_v4  ;;  %1482 = vmatpush1.msra.mxu1 %v947_v34  ;;  %v949_v4 = vld [vmem:[#allocation10 + $0x68] sm:$0xff]  ;;  %v1118_v34 = vld [vmem:[#allocation10 + $0x5b0] sm:$0xff] }
 0x43e   :  { %1599 = vmatprep.subr.mxu0 %v1058_v35  ;;  %1483 = vmatprep.subr.mxu1 %v939_v36  ;;  %v941_v35 = vld [vmem:[#allocation10 + $0x28] sm:$0xff]  ;;  %v1110_v36 = vld [vmem:[#allocation10 + $0x570] sm:$0xff] }
 0x43f   :  { %1600 = vmatpush1.msra.mxu0 %v1057_v37  ;;  %1484 = vmatpush1.msra.mxu1 %v938_v38  ;;  %v940_v37 = vld [vmem:[#allocation10 + $0x20] sm:$0xff]  ;;  %v1109_v38 = vld [vmem:[#allocation10 + $0x568] sm:$0xff] }
 0x440   :  { %1601 = vmatprep.subr.mxu0 %v1049_v21  ;;  %1485 = vmatprep.subr.mxu1 %v1218_v39  ;;  %v1220_v21 = vld [vmem:[#allocation10 + $0x8e0] sm:$0xff]  ;;  %v1101_v39 = vld [vmem:[#allocation10 + $0x528] sm:$0xff] }
 0x441   :  { %1602 = vmatpush1.msra.mxu0 %v1048_v40  ;;  %1486 = vmatpush2.msra.mxu1 %v1217_v41  ;;  %v1219_v40 = vld [vmem:[#allocation10 + $0x8d8] sm:$0xff]  ;;  %v1100_v41 = vld [vmem:[#allocation10 + $0x520] sm:$0xff] }
 0x442   :  { %1603 = vmatprep.subr.mxu0 %v1040_v42  ;;  %1487 = vmatprep.subr.mxu1 %v1209_v43  ;;  %v1211_v42 = vld [vmem:[#allocation10 + $0x898] sm:$0xff]  ;;  %v1092_v43 = vld [vmem:[#allocation10 + $0x4e0] sm:$0xff] }
 0x443   :  { %1604 = vmatpush1.msra.mxu0 %v1039_v46  ;;  %1488 = vmatpush2.msra.mxu1 %v1208_v50  ;;  %v1210_v46 = vld [vmem:[#allocation10 + $0x890] sm:$0xff]  ;;  %v1091_v50 = vld [vmem:[#allocation10 + $0x4d8] sm:$0xff] }
 0x444   :  { %1605 = vmatprep.subr.mxu0 %v1031_v51  ;;  %1489 = vmatprep.subr.mxu1 %v1200_v52  ;;  %v1202_v51 = vld [vmem:[#allocation10 + $0x850] sm:$0xff]  ;;  %v1083_v52 = vld [vmem:[#allocation10 + $0x498] sm:$0xff] }
 0x445   :  { %1606 = vmatpush1.msra.mxu0 %v1030_v53  ;;  %1490 = vmatpush2.msra.mxu1 %v1199_v54  ;;  %v1201_v53 = vld [vmem:[#allocation10 + $0x848] sm:$0xff]  ;;  %v1082_v54 = vld [vmem:[#allocation10 + $0x490] sm:$0xff] }
 0x446   :  { %1607 = vmatprep.subr.mxu0 %v1022_v59  ;;  %1491 = vmatprep.subr.mxu1 %v1191_v1  ;;  %v1193_v59 = vld [vmem:[#allocation10 + $0x808] sm:$0xff]  ;;  %v1192_v1 = vld [vmem:[#allocation10 + $0x800] sm:$0xff] }
 0x447   :  { %1608 = vmatpush1.msra.mxu0 %v1021_v55  ;;  %1492 = vmatpush2.msra.mxu1 %v1190_v56  ;;  %v1256_v55 = vld [vmem:[#allocation10 + $0xa00] sm:$0xff] }
 0x448   :  { %1609 = vmatprep.subr.mxu0 %v1013_v8  ;;  %1493 = vmatprep.subr.mxu1 %v1182_v47  ;;  %v1184_v56 = vld [vmem:[#allocation10 + $0x7c0] sm:$0xff]  ;;  %v1255_v8 = vld [vmem:[#allocation10 + $0x9f8] sm:$0xff] }
 0x449   :  { %1610 = vmatpush1.msra.mxu0 %v1012_v19  ;;  %1494 = vmatpush2.msra.mxu1 %v1181_v57  ;;  %v1183_v47 = vld [vmem:[#allocation10 + $0x7b8] sm:$0xff] }
 0x44a   :  { %1611 = vmatprep.subr.mxu0 %v1004_v58  ;;  %1495 = vmatprep.subr.mxu1 %v1173_v61  ;;  %v1247_v19 = vld [vmem:[#allocation10 + $0x9b8] sm:$0xff]  ;;  %v1246_v58 = vld [vmem:[#allocation10 + $0x9b0] sm:$0xff] }
 0x44b   :  { %1612 = vmatpush1.msra.mxu0 %v1003_v62  ;;  %1496 = vmatpush2.msra.mxu1 %v1172_v63  ;;  %v1175_v57 = vld [vmem:[#allocation10 + $0x778] sm:$0xff]  ;;  %v1174_v61 = vld [vmem:[#allocation10 + $0x770] sm:$0xff] }
 0x44c   :  { %1613 = vmatprep.subr.mxu0 %v995_v15  ;;  %1497 = vmatprep.subr.mxu1 %v1164_v2  ;;  %v1238_v62 = vld [vmem:[#allocation10 + $0x970] sm:$0xff]  ;;  %v1237_v15 = vld [vmem:[#allocation10 + $0x968] sm:$0xff] }
 0x44d   :  { %1614 = vmatpush1.msra.mxu0 %v994_v5  ;;  %1498 = vmatpush2.msra.mxu1 %v1163_v9  ;;  %v1166_v63 = vld [vmem:[#allocation10 + $0x730] sm:$0xff]  ;;  %v1165_v2 = vld [vmem:[#allocation10 + $0x728] sm:$0xff] }
 0x44e   :  { %1615 = vmatprep.subr.mxu0 %v986_v14  ;;  %1499 = vmatprep.subr.mxu1 %v1155_v16  ;;  %v1229_v5 = vld [vmem:[#allocation10 + $0x928] sm:$0xff]  ;;  %v1228_v14 = vld [vmem:[#allocation10 + $0x920] sm:$0xff] }
 0x44f   :  { %1616 = vmatpush1.msra.mxu0 %v985_v17  ;;  %1500 = vmatpush2.msra.mxu1 %v1154_v18  ;;  %v1157_v9 = vld [vmem:[#allocation10 + $0x6e8] sm:$0xff]  ;;  %v1156_v16 = vld [vmem:[#allocation10 + $0x6e0] sm:$0xff]  ;;  %v1078_v17 = vld [vmem:[#allocation10 + $0x470] sm:$0xff] }
 0x450   :  { %1617 = vmatprep.subr.mxu0 %v977_v7  ;;  %1501 = vmatprep.subr.mxu1 %v1146_v20  ;;  %v1148_v18 = vld [vmem:[#allocation10 + $0x6a0] sm:$0xff]  ;;  %v1077_v7 = vld [vmem:[#allocation10 + $0x468] sm:$0xff]  ;;  %v1147_v20 = vld [vmem:[#allocation10 + $0x698] sm:$0xff] }
 0x451   :  { %1618 = vmatpush1.msra.mxu0 %v976_v22  ;;  %1502 = vmatpush2.msra.mxu1 %v1145_v23  ;;  %v1069_v22 = vld [vmem:[#allocation10 + $0x428] sm:$0xff]  ;;  %v1139_v23 = vld [vmem:[#allocation10 + $0x658] sm:$0xff] }
 0x452   :  { %1619 = vmatprep.subr.mxu0 %v968_v24  ;;  %1503 = vmatprep.subr.mxu1 %v1137_v26  ;;  %v1068_v24 = vld [vmem:[#allocation10 + $0x420] sm:$0xff]  ;;  %v1138_v26 = vld [vmem:[#allocation10 + $0x650] sm:$0xff] }
 0x453   :  { %1620 = vmatpush1.msra.mxu0 %v967_v60  ;;  %1504 = vmatpush2.msra.mxu1 %v1136_v6  ;;  %v1060_v60 = vld [vmem:[#allocation10 + $0x3e0] sm:$0xff]  ;;  %v1130_v6 = vld [vmem:[#allocation10 + $0x610] sm:$0xff] }
 0x454   :  { %1621 = vmatprep.subr.mxu0 %v959_v28  ;;  %1505 = vmatprep.subr.mxu1 %v1128_v29  ;;  %v1059_v28 = vld [vmem:[#allocation10 + $0x3d8] sm:$0xff]  ;;  %v1129_v29 = vld [vmem:[#allocation10 + $0x608] sm:$0xff] }
 0x455   :  { %1622 = vmatpush1.msra.mxu0 %v958_v30  ;;  %1506 = vmatpush2.msra.mxu1 %v1127_v31  ;;  %v1051_v30 = vld [vmem:[#allocation10 + $0x398] sm:$0xff]  ;;  %v1121_v31 = vld [vmem:[#allocation10 + $0x5c8] sm:$0xff] }
 0x456   :  { %1623 = vmatprep.subr.mxu0 %v950_v32  ;;  %1507 = vmatprep.subr.mxu1 %v1119_v33  ;;  %v1050_v32 = vld [vmem:[#allocation10 + $0x390] sm:$0xff]  ;;  %v1120_v33 = vld [vmem:[#allocation10 + $0x5c0] sm:$0xff] }
 0x457   :  { %1624 = vmatpush1.msra.mxu0 %v949_v4  ;;  %1508 = vmatpush2.msra.mxu1 %v1118_v34  ;;  %v1042_v4 = vld [vmem:[#allocation10 + $0x350] sm:$0xff]  ;;  %v1112_v34 = vld [vmem:[#allocation10 + $0x580] sm:$0xff] }
 0x458   :  { %1625 = vmatprep.subr.mxu0 %v941_v35  ;;  %1509 = vmatprep.subr.mxu1 %v1110_v36  ;;  %v1041_v35 = vld [vmem:[#allocation10 + $0x348] sm:$0xff]  ;;  %v1111_v36 = vld [vmem:[#allocation10 + $0x578] sm:$0xff] }
 0x459   :  { %1626 = vmatpush1.msra.mxu0 %v940_v37  ;;  %1510 = vmatpush2.msra.mxu1 %v1109_v38  ;;  %v1033_v37 = vld [vmem:[#allocation10 + $0x308] sm:$0xff]  ;;  %v1103_v38 = vld [vmem:[#allocation10 + $0x538] sm:$0xff] }
 0x45a   :  { %1627 = vmatprep.subr.mxu0 %v1220_v21  ;;  %1511 = vmatprep.subr.mxu1 %v1101_v39  ;;  %v1032_v21 = vld [vmem:[#allocation10 + $0x300] sm:$0xff]  ;;  %v1102_v39 = vld [vmem:[#allocation10 + $0x530] sm:$0xff] }
 0x45b   :  { %1628 = vmatpush2.msra.mxu0 %v1219_v40  ;;  %1512 = vmatpush2.msra.mxu1 %v1100_v41  ;;  %v1024_v40 = vld [vmem:[#allocation10 + $0x2c0] sm:$0xff]  ;;  %v1094_v41 = vld [vmem:[#allocation10 + $0x4f0] sm:$0xff] }
 0x45c   :  { %1629 = vmatprep.subr.mxu0 %v1211_v42  ;;  %1513 = vmatprep.subr.mxu1 %v1092_v43  ;;  %v1023_v42 = vld [vmem:[#allocation10 + $0x2b8] sm:$0xff]  ;;  %v1093_v43 = vld [vmem:[#allocation10 + $0x4e8] sm:$0xff] }
 0x45d   :  { %1630 = vmatpush2.msra.mxu0 %v1210_v46  ;;  %1514 = vmatpush2.msra.mxu1 %v1091_v50  ;;  %v1015_v46 = vld [vmem:[#allocation10 + $0x278] sm:$0xff]  ;;  %v1085_v50 = vld [vmem:[#allocation10 + $0x4a8] sm:$0xff] }
 0x45e   :  { %1631 = vmatprep.subr.mxu0 %v1202_v51  ;;  %1515 = vmatprep.subr.mxu1 %v1083_v52  ;;  %v1014_v51 = vld [vmem:[#allocation10 + $0x270] sm:$0xff]  ;;  %v1084_v52 = vld [vmem:[#allocation10 + $0x4a0] sm:$0xff] }
 0x45f   :  { %1632 = vmatpush2.msra.mxu0 %v1201_v53  ;;  %1516 = vmatpush2.msra.mxu1 %v1082_v54  ;;  %v1006_v53 = vld [vmem:[#allocation10 + $0x230] sm:$0xff]  ;;  %v1005_v54 = vld [vmem:[#allocation10 + $0x228] sm:$0xff] }
 0x460   :  { %1633 = vmatprep.subr.mxu0 %v1193_v59  ;;  %1518 = vmatmul.mubr.f32.vlgmr.msra.gmra.mxu1 %v3458_v3  ;;  %v1258_v59 = vld [vmem:[#allocation10 + $0xa10] sm:$0xff] }
 0x461   :  { %1634 = vmatpush2.msra.mxu0 %v1192_v1  ;;  %1690 = vmatprep.subr.mxu1 %v1256_v55  ;;  %v997_v1 = vld [vmem:[#allocation10 + $0x1e8] sm:$0xff] }
 0x462   :  { %1635 = vmatprep.subr.mxu0 %v1184_v56  ;;  %1691 = vmatpush1.msra.mxu1 %v1255_v8  ;;  %v1257_v55 = vld [vmem:[#allocation10 + $0xa08] sm:$0xff]  ;;  %v996_v56 = vld [vmem:[#allocation10 + $0x1e0] sm:$0xff] }
 0x463   :  { %1636 = vmatpush2.msra.mxu0 %v1183_v47  ;;  %1692 = vmatprep.subr.mxu1 %v1247_v19  ;;  %v1249_v8 = vld [vmem:[#allocation10 + $0x9c8] sm:$0xff]  ;;  %v988_v47 = vld [vmem:[#allocation10 + $0x1a0] sm:$0xff] }
 0x464   :  { %1637 = vmatprep.subr.mxu0 %v1175_v57  ;;  %1693 = vmatpush1.msra.mxu1 %v1246_v58  ;;  %v1248_v19 = vld [vmem:[#allocation10 + $0x9c0] sm:$0xff]  ;;  %v987_v57 = vld [vmem:[#allocation10 + $0x198] sm:$0xff] }
 0x465   :  { %1638 = vmatpush2.msra.mxu0 %v1174_v61  ;;  %1694 = vmatprep.subr.mxu1 %v1238_v62  ;;  %v1240_v58 = vld [vmem:[#allocation10 + $0x980] sm:$0xff]  ;;  %v979_v61 = vld [vmem:[#allocation10 + $0x158] sm:$0xff] }
 0x466   :  { %1639 = vmatprep.subr.mxu0 %v1166_v63  ;;  %1695 = vmatpush1.msra.mxu1 %v1237_v15  ;;  %v1239_v62 = vld [vmem:[#allocation10 + $0x978] sm:$0xff]  ;;  %v978_v63 = vld [vmem:[#allocation10 + $0x150] sm:$0xff] }
 0x467   :  { %1640 = vmatpush2.msra.mxu0 %v1165_v2  ;;  %1696 = vmatprep.subr.mxu1 %v1229_v5  ;;  %v1231_v15 = vld [vmem:[#allocation10 + $0x938] sm:$0xff]  ;;  %v970_v2 = vld [vmem:[#allocation10 + $0x110] sm:$0xff] }
 0x468   :  { %1641 = vmatprep.subr.mxu0 %v1157_v9  ;;  %1697 = vmatpush1.msra.mxu1 %v1228_v14  ;;  %v1230_v5 = vld [vmem:[#allocation10 + $0x930] sm:$0xff]  ;;  %v969_v9 = vld [vmem:[#allocation10 + $0x108] sm:$0xff]  ;;  %v1223_v14 = vld [vmem:[#allocation10 + $0x8f8] sm:$0xff] }
 0x469   :  { %1730 = vmatprep.mubr.f32.mxu1 %v2834_v0  ;;  %1642 = vmatpush2.msra.mxu0 %v1156_v16  ;;  %v961_v16 = vld [vmem:[#allocation10 + $0xc8] sm:$0xff] }
 0x46a   :  { %2385 = vmatmul.mubr.msk.f32.vlgmr.msra.gmra.mxu1 %vm392_vm2, %v3443_v12  ;;  %1737 = vmatprep.subr.mxu1 %v1078_v17  ;;  %v1079_v17 = vld [vmem:[#allocation10 + $0x478] sm:$0xff] }
 0x46b   :  { %1643 = vmatprep.subr.mxu0 %v1148_v18  ;;  %1738 = vmatpush1.msra.mxu1 %v1077_v7  ;;  %v960_v18 = vld [vmem:[#allocation10 + $0xc0] sm:$0xff]  ;;  %v1214_v7 = vld [vmem:[#allocation10 + $0x8b0] sm:$0xff] }
 0x46c   :  { %1801 = vmatprep.mubr.f32.mxu1 %v3455_v45  ;;  %1644 = vmatpush2.msra.mxu0 %v1147_v20  ;;  %v952_v20 = vld [vmem:[#allocation10 + $0x80] sm:$0xff] }
 0x46d   :  { %1739 = vmatprep.subr.mxu1 %v1069_v22  ;;  %1645 = vmatprep.subr.mxu0 %v1139_v23  ;;  %v1070_v22 = vld [vmem:[#allocation10 + $0x430] sm:$0xff]  ;;  %v951_v23 = vld [vmem:[#allocation10 + $0x78] sm:$0xff] }
 0x46e   :  { %1740 = vmatpush1.msra.mxu1 %v1068_v24  ;;  %1646 = vmatpush2.msra.mxu0 %v1138_v26  ;;  %v1205_v24 = vld [vmem:[#allocation10 + $0x868] sm:$0xff]  ;;  %v943_v26 = vld [vmem:[#allocation10 + $0x38] sm:$0xff] }
 0x46f   :  { %1741 = vmatprep.subr.mxu1 %v1060_v60  ;;  %1647 = vmatprep.subr.mxu0 %v1130_v6  ;;  %v1061_v60 = vld [vmem:[#allocation10 + $0x3e8] sm:$0xff]  ;;  %v942_v6 = vld [vmem:[#allocation10 + $0x30] sm:$0xff] }
 0x470   :  { %1742 = vmatpush1.msra.mxu1 %v1059_v28  ;;  %1648 = vmatpush2.msra.mxu0 %v1129_v29  ;;  %v1196_v28 = vld [vmem:[#allocation10 + $0x820] sm:$0xff]  ;;  %v1222_v29 = vld [vmem:[#allocation10 + $0x8f0] sm:$0xff] }
 0x471   :  { %1743 = vmatprep.subr.mxu1 %v1051_v30  ;;  %1649 = vmatprep.subr.mxu0 %v1121_v31  ;;  %v1052_v30 = vld [vmem:[#allocation10 + $0x3a0] sm:$0xff]  ;;  %v1221_v31 = vld [vmem:[#allocation10 + $0x8e8] sm:$0xff] }
 0x472   :  { %1744 = vmatpush1.msra.mxu1 %v1050_v32  ;;  %1650 = vmatpush2.msra.mxu0 %v1120_v33  ;;  %v1187_v32 = vld [vmem:[#allocation10 + $0x7d8] sm:$0xff] }
 0x473   :  { %1745 = vmatprep.subr.mxu1 %v1042_v4  ;;  %1651 = vmatprep.subr.mxu0 %v1112_v34  ;;  %v1043_v33 = vld [vmem:[#allocation10 + $0x358] sm:$0xff]  ;;  %v1212_v4 = vld [vmem:[#allocation10 + $0x8a0] sm:$0xff]  ;;  %v1178_v34 = vld [vmem:[#allocation10 + $0x790] sm:$0xff] }
 0x474   :  { %1746 = vmatpush1.msra.mxu1 %v1041_v35  ;;  %1652 = vmatpush2.msra.mxu0 %v1111_v36  ;;  %v1204_v35 = vld [vmem:[#allocation10 + $0x860] sm:$0xff]  ;;  %v1034_v36 = vld [vmem:[#allocation10 + $0x310] sm:$0xff] }
 0x475   :  { %1747 = vmatprep.subr.mxu1 %v1033_v37  ;;  %1653 = vmatprep.subr.mxu0 %v1103_v38  ;;  %v1203_v37 = vld [vmem:[#allocation10 + $0x858] sm:$0xff]  ;;  %v1169_v38 = vld [vmem:[#allocation10 + $0x748] sm:$0xff] }
 0x476   :  { %1748 = vmatpush1.msra.mxu1 %v1032_v21  ;;  %1654 = vmatpush2.msra.mxu0 %v1102_v39  ;;  %v1195_v21 = vld [vmem:[#allocation10 + $0x818] sm:$0xff]  ;;  %v1025_v39 = vld [vmem:[#allocation10 + $0x2c8] sm:$0xff] }
 0x477   :  { %1749 = vmatprep.subr.mxu1 %v1024_v40  ;;  %1655 = vmatprep.subr.mxu0 %v1094_v41  ;;  %v1194_v40 = vld [vmem:[#allocation10 + $0x810] sm:$0xff]  ;;  %v1160_v41 = vld [vmem:[#allocation10 + $0x700] sm:$0xff] }
 0x478   :  { %1750 = vmatpush1.msra.mxu1 %v1023_v42  ;;  %1656 = vmatpush2.msra.mxu0 %v1093_v43  ;;  %v1186_v42 = vld [vmem:[#allocation10 + $0x7d0] sm:$0xff]  ;;  %v1016_v43 = vld [vmem:[#allocation10 + $0x280] sm:$0xff] }
 0x479   :  { %1751 = vmatprep.subr.mxu1 %v1015_v46  ;;  %1657 = vmatprep.subr.mxu0 %v1085_v50  ;;  %v1185_v46 = vld [vmem:[#allocation10 + $0x7c8] sm:$0xff]  ;;  %v1151_v50 = vld [vmem:[#allocation10 + $0x6b8] sm:$0xff] }
 0x47a   :  { %1752 = vmatpush1.msra.mxu1 %v1014_v51  ;;  %1658 = vmatpush2.msra.mxu0 %v1084_v52  ;;  %v1177_v51 = vld [vmem:[#allocation10 + $0x788] sm:$0xff]  ;;  %v1007_v52 = vld [vmem:[#allocation10 + $0x238] sm:$0xff] }
 0x47b   :  { %1753 = vmatprep.subr.mxu1 %v1006_v53  ;;  %1660 = vmatmul.mubr.f32.vlgmr.msra.gmra.mxu0 %v3458_v3  ;;  %v1176_v53 = vld [vmem:[#allocation10 + $0x780] sm:$0xff] }
 0x47c   :  { %1754 = vmatpush1.msra.mxu1 %v1005_v54  ;;  %1832 = vmatprep.subr.mxu0 %v1258_v59  ;;  %v1142_v54 = vld [vmem:[#allocation10 + $0x670] sm:$0xff]  ;;  %v1168_v59 = vld [vmem:[#allocation10 + $0x740] sm:$0xff] }
 0x47d   :  { %1755 = vmatprep.subr.mxu1 %v997_v1  ;;  %1833 = vmatpush1.msra.mxu0 %v1257_v55  ;;  %v998_v1 = vld [vmem:[#allocation10 + $0x1f0] sm:$0xff]  ;;  %v1167_v55 = vld [vmem:[#allocation10 + $0x738] sm:$0xff] }
 0x47e   :  { %1756 = vmatpush1.msra.mxu1 %v996_v56  ;;  %1834 = vmatprep.subr.mxu0 %v1249_v8  ;;  %v1133_v56 = vld [vmem:[#allocation10 + $0x628] sm:$0xff]  ;;  %v1159_v8 = vld [vmem:[#allocation10 + $0x6f8] sm:$0xff] }
 0x47f   :  { %1757 = vmatprep.subr.mxu1 %v988_v47  ;;  %1835 = vmatpush1.msra.mxu0 %v1248_v19  ;;  %v989_v47 = vld [vmem:[#allocation10 + $0x1a8] sm:$0xff]  ;;  %v1158_v19 = vld [vmem:[#allocation10 + $0x6f0] sm:$0xff] }
 0x480   :  { %1758 = vmatpush1.msra.mxu1 %v987_v57  ;;  %1836 = vmatprep.subr.mxu0 %v1240_v58  ;;  %v1124_v57 = vld [vmem:[#allocation10 + $0x5e0] sm:$0xff]  ;;  %v1150_v58 = vld [vmem:[#allocation10 + $0x6b0] sm:$0xff] }
 0x481   :  { %1759 = vmatprep.subr.mxu1 %v979_v61  ;;  %1837 = vmatpush1.msra.mxu0 %v1239_v62  ;;  %v980_v61 = vld [vmem:[#allocation10 + $0x160] sm:$0xff]  ;;  %v1149_v62 = vld [vmem:[#allocation10 + $0x6a8] sm:$0xff] }
 0x482   :  { %1760 = vmatpush1.msra.mxu1 %v978_v63  ;;  %1838 = vmatprep.subr.mxu0 %v1231_v15  ;;  %v1115_v63 = vld [vmem:[#allocation10 + $0x598] sm:$0xff]  ;;  %v1141_v15 = vld [vmem:[#allocation10 + $0x668] sm:$0xff] }
 0x483   :  { %1761 = vmatprep.subr.mxu1 %v970_v2  ;;  %1839 = vmatpush1.msra.mxu0 %v1230_v5  ;;  %v971_v2 = vld [vmem:[#allocation10 + $0x118] sm:$0xff]  ;;  %v1140_v5 = vld [vmem:[#allocation10 + $0x660] sm:$0xff] }
 0x484   :  { %1872 = vmatprep.mubr.f32.mxu0 %v2834_v0  ;;  %1762 = vmatpush1.msra.mxu1 %v969_v9  ;;  %v1106_v9 = vld [vmem:[#allocation10 + $0x550] sm:$0xff] }
 0x485   :  { %2386 = vmatmul.mubr.msk.f32.vlgmr.msra.gmra.mxu0 %vm392_vm2, %v3443_v12  ;;  %2413 = vmatprep.subr.mxu0 %v1223_v14  ;;  %v1132_v14 = vld [vmem:[#allocation10 + $0x620] sm:$0xff] }
 0x486   :  { %1763 = vmatprep.subr.mxu1 %v961_v16  ;;  %2414 = vmatpush3.msra.mxu0 %v1079_v17  ;;  %v962_v16 = vld [vmem:[#allocation10 + $0xd0] sm:$0xff]  ;;  %v1131_v17 = vld [vmem:[#allocation10 + $0x618] sm:$0xff] }
 0x487   :  { %1943 = vmatprep.mubr.f32.mxu0 %v3455_v45  ;;  %1764 = vmatpush1.msra.mxu1 %v960_v18  ;;  %v1213_v45 = vld [vmem:[#allocation10 + $0x8a8] sm:$0xff] }
 0x488   :  { %2415 = vmatprep.subr.mxu0 %v1214_v7  ;;  %1765 = vmatprep.subr.mxu1 %v952_v20  ;;  %v1097_v18 = vld [vmem:[#allocation10 + $0x508] sm:$0xff]  ;;  %v1123_v7 = vld [vmem:[#allocation10 + $0x5d8] sm:$0xff] }
 0x489   :  { %2416 = vmatpush3.msra.mxu0 %v1070_v22  ;;  %1766 = vmatpush1.msra.mxu1 %v951_v23  ;;  %v953_v20 = vld [vmem:[#allocation10 + $0x88] sm:$0xff]  ;;  %v1122_v22 = vld [vmem:[#allocation10 + $0x5d0] sm:$0xff]  ;;  %v1088_v23 = vld [vmem:[#allocation10 + $0x4c0] sm:$0xff] }
 0x48a   :  { %2417 = vmatprep.subr.mxu0 %v1205_v24  ;;  %1767 = vmatprep.subr.mxu1 %v943_v26  ;;  %v1114_v24 = vld [vmem:[#allocation10 + $0x590] sm:$0xff]  ;;  %v944_v26 = vld [vmem:[#allocation10 + $0x40] sm:$0xff] }
 0x48b   :  { %2418 = vmatpush3.msra.mxu0 %v1061_v60  ;;  %1768 = vmatpush1.msra.mxu1 %v942_v6  ;;  %v1113_v60 = vld [vmem:[#allocation10 + $0x588] sm:$0xff] }
 0x48c   :  { %2419 = vmatprep.subr.mxu0 %v1196_v28  ;;  %1769 = vmatprep.subr.mxu1 %v1222_v29  ;;  %v1105_v6 = vld [vmem:[#allocation10 + $0x548] sm:$0xff]  ;;  %v1104_v28 = vld [vmem:[#allocation10 + $0x540] sm:$0xff] }
 0x48d   :  { %2420 = vmatpush3.msra.mxu0 %v1052_v30  ;;  %1770 = vmatpush2.msra.mxu1 %v1221_v31  ;;  %v1096_v29 = vld [vmem:[#allocation10 + $0x500] sm:$0xff]  ;;  %v1095_v30 = vld [vmem:[#allocation10 + $0x4f8] sm:$0xff] }
 0x48e   :  { %2421 = vmatprep.subr.mxu0 %v1187_v32  ;;  %1771 = vmatprep.subr.mxu1 %v1213_v45  ;;  %v1087_v31 = vld [vmem:[#allocation10 + $0x4b8] sm:$0xff]  ;;  %v1086_v32 = vld [vmem:[#allocation10 + $0x4b0] sm:$0xff] }
 0x48f   :  { %2422 = vmatpush3.msra.mxu0 %v1043_v33  ;;  %1772 = vmatpush2.msra.mxu1 %v1212_v4  ;;  %v1259_v45 = vld [vmem:[#allocation10 + $0xa18] sm:$0xff]  ;;  %v1250_v33 = vld [vmem:[#allocation10 + $0x9d0] sm:$0xff]  ;;  %v1241_v4 = vld [vmem:[#allocation10 + $0x988] sm:$0xff] }
 0x490   :  { %2423 = vmatprep.subr.mxu0 %v1178_v34  ;;  %1773 = vmatprep.subr.mxu1 %v1204_v35  ;;  %v1232_v34 = vld [vmem:[#allocation10 + $0x940] sm:$0xff] }
 0x491   :  { %2424 = vmatpush3.msra.mxu0 %v1034_v36  ;;  %1774 = vmatpush2.msra.mxu1 %v1203_v37 }
 0x492   :  { %2425 = vmatprep.subr.mxu0 %v1169_v38  ;;  %1775 = vmatprep.subr.mxu1 %v1195_v21 }
 0x493   :  { %2426 = vmatpush3.msra.mxu0 %v1025_v39  ;;  %1776 = vmatpush2.msra.mxu1 %v1194_v40 }
 0x494   :  { %2427 = vmatprep.subr.mxu0 %v1160_v41  ;;  %1777 = vmatprep.subr.mxu1 %v1186_v42 }
 0x495   :  { %2428 = vmatpush3.msra.mxu0 %v1016_v43  ;;  %1778 = vmatpush2.msra.mxu1 %v1185_v46 }
 0x496   :  { %2429 = vmatprep.subr.mxu0 %v1151_v50  ;;  %1779 = vmatprep.subr.mxu1 %v1177_v51 }
 0x497   :  { %2430 = vmatpush3.msra.mxu0 %v1007_v52  ;;  %1780 = vmatpush2.msra.mxu1 %v1176_v53 }
 0x498   :  { %2431 = vmatprep.subr.mxu0 %v1142_v54  ;;  %1781 = vmatprep.subr.mxu1 %v1168_v59 }
 0x499   :  { %2432 = vmatpush3.msra.mxu0 %v998_v1  ;;  %1782 = vmatpush2.msra.mxu1 %v1167_v55 }
 0x49a   :  { %2433 = vmatprep.subr.mxu0 %v1133_v56  ;;  %1783 = vmatprep.subr.mxu1 %v1159_v8 }
 0x49b   :  { %2434 = vmatpush3.msra.mxu0 %v989_v47  ;;  %1784 = vmatpush2.msra.mxu1 %v1158_v19 }
 0x49c   :  { %2435 = vmatprep.subr.mxu0 %v1124_v57  ;;  %1785 = vmatprep.subr.mxu1 %v1150_v58 }
 0x49d   :  { %2436 = vmatpush3.msra.mxu0 %v980_v61  ;;  %1786 = vmatpush2.msra.mxu1 %v1149_v62 }
 0x49e   :  { %2437 = vmatprep.subr.mxu0 %v1115_v63  ;;  %1787 = vmatprep.subr.mxu1 %v1141_v15 }
 0x49f   :  { %2438 = vmatpush3.msra.mxu0 %v971_v2  ;;  %1788 = vmatpush2.msra.mxu1 %v1140_v5 }
 0x4a0   :  { %2439 = vmatprep.subr.mxu0 %v1106_v9  ;;  %1789 = vmatprep.subr.mxu1 %v1132_v14  ;;  %v1294_v9 = vsub.s32 7, %v2963_v10 }
 0x4a1   :  { %2440 = vmatpush3.msra.mxu0 %v962_v16  ;;  %1790 = vmatpush2.msra.mxu1 %v1131_v17  ;;  %v3524_v16 = vpop.permute.xlu1 %2060 }
 0x4a2   :  { %2441 = vmatprep.subr.mxu0 %v1097_v18  ;;  %1791 = vmatprep.subr.mxu1 %v1123_v7 }
 0x4a3   :  { %2442 = vmatpush3.msra.mxu0 %v953_v20  ;;  %1792 = vmatpush2.msra.mxu1 %v1122_v22 }
 0x4a4   :  { %2443 = vmatprep.subr.mxu0 %v1088_v23  ;;  %1793 = vmatprep.subr.mxu1 %v1114_v24 }
 0x4a5   :  { %2444 = vmatpush3.msra.mxu0 %v944_v26  ;;  %1794 = vmatpush2.msra.mxu1 %v1113_v60 }
 0x4a6   :  { %1944 = vmatmul.mubr.f32.vlgmr.msra.gmra.mxu0 %v3458_v3  ;;  %1795 = vmatprep.subr.mxu1 %v1105_v6 }
 0x4a7   :  { %1796 = vmatpush2.msra.mxu1 %v1104_v28  ;;  %v2382_v28 = vld [vmem:[#allocation12 + $0x8] ss:$0 sm:$0xff] }
 0x4a8   :  { %1797 = vmatprep.subr.mxu1 %v1096_v29 }
 0x4a9   :  { %1798 = vmatpush2.msra.mxu1 %v1095_v30 }
 0x4aa   :  { %1799 = vmatprep.subr.mxu1 %v1087_v31  ;;  %v3528_v31 = vpop.permute.xlu0 %2041 }
 0x4ab   :  { %1800 = vmatpush2.msra.mxu1 %v1086_v32 }
 0x4ac   :  { %1802 = vmatmul.mubr.f32.vlgmr.msra.gmra.mxu1 %v3458_v3  ;;  %2503 = vmatprep.subr.mxu1 %v2834_v0  ;;  %v1260_v3 = vld [vmem:[#allocation12] sm:$0xff] }
 0x4ad   :  { %2504 = vmatpush3.msra.mxu1 %v1259_v45  ;;  %2511 = vmatprep.mubr.msk.f32.mxu1 %vm2835_vm1, %v2834_v0  ;;  %v1267_v35 = vrot.slane %v1260_v3, %v2966_v11  ;;  %v1271_v36 = vrot.slane %v1260_v3, %v2971_v13  ;;  %v1275_v11 = vrot.slane %v1260_v3, %v3166_v27 }
 0x4ae   :  { %2505 = vmatprep.subr.mxu1 %v2834_v0  ;;  %v1279_v13 = vrot.slane %v1260_v3, %v526_v48  ;;  %v1283_v27 = vrot.slane %v1260_v3, %v530_v44  ;;  %v1287_v48 = vrot.slane %v1260_v3, %v534_v25  ;;  %v1291_v17 = vrot.slane %v1260_v3, %v538_v49 }
 0x4af   :  { %2506 = vmatpush3.msra.mxu1 %v1250_v33  ;;  %v1295_v18 = vrot.slane %v1260_v3, %v1294_v9 }
 0x4b0   :  { %2507 = vmatprep.subr.mxu1 %v2834_v0 }
 0x4b1   :  { %2508 = vmatpush3.msra.mxu1 %v1241_v4 }
 0x4b2   :  { %2509 = vmatprep.subr.mxu1 %v2834_v0 }
 0x4b3   :  { %2510 = vmatpush3.msra.mxu1 %v1232_v34 }
 0x4b4   :  { %2512 = vmatmul.mubr.msk.f32.vlgmr.msra.gmra.mxu1 %vm392_vm2, %v3443_v12  ;;  %2514 = vmatprep.subr.mxu1 %v2834_v0 }
 0x4b5   :  { %2522 = vmatprep.mubr.msk.f32.mxu1 %vm2835_vm1, %v2834_v0 }
 0x4df   :  { %v1448_v37 = vpop.f32.mrf.mxu1 }
 0x4e1   :  { %v1450_v42 = vpop.f32.mrf.mxu1 }
 0x4f0   :  { %v1377_v38 = vpop.f32.mrf.mxu0 }
 0x4f1   :  { %v1378_v21 = vadd.f32 %v1377_v38, %v1267_v35  ;;  %v3539_v35 = vpop.permute.xlu0 %2050 }
 0x4f2   :  { %v1379_v39 = vpop.f32.mrf.mxu0 }
 0x4f3   :  { %v1449_v40 = vadd.f32 %v1448_v37, %v1378_v21  ;;  %v1380_v41 = vadd.f32 %v1379_v39, %v1271_v36 }
 0x4f5   :  { %v3492_v43 = vmax.f32 %v1449_v40, 0.0  ;;  %v1451_v12 = vadd.f32 %v1450_v42, %v1380_v41 }
 0x4f7   :  { %2037 = vrot.lane.b32.xlu1 %v3492_v43, %s2836_s0  ;;  %v3496_v46 = vmax.f32 %v1451_v12, 0.0 }
 0x4f9   :  { %v1590_v50 = vpop.f32.mrf.mxu0  ;;  %v2054_v21 = vmax.f32 %v3496_v46, %v3528_v31 }
 0x4fb   :  { %2046 = vrot.lane.b32.xlu1 %v3496_v46, %s2836_s0  ;;  %v1592_v1 = vpop.f32.mrf.mxu0 }
 0x520   :  { %v1519_v51 = vpop.f32.mrf.mxu1 }
 0x521   :  { %v1520_v52 = vadd.f32 %v1519_v51, %v1275_v11 }
 0x522   :  { %v1521_v53 = vpop.f32.mrf.mxu1 }
 0x523   :  { %v1591_v54 = vadd.f32 %v1590_v50, %v1520_v52  ;;  %v1522_v59 = vadd.f32 %v1521_v53, %v1279_v13 }
 0x525   :  { %v3503_v55 = vmax.f32 %v1591_v54, 0.0  ;;  %v1593_v56 = vadd.f32 %v1592_v1, %v1522_v59 }
 0x527   :  { %v2022_v8 = vmax.f32 %v1593_v56, 0.0  ;;  %2065 = vrot.lane.b32.xlu0 %v3503_v55, %s2836_s0 }
 0x529   :  { %2056 = vrot.lane.b32.xlu1 %v2022_v8, %s2838_s4 }
 0x52a   :  { %v1732_v47 = vpop.f32.mrf.mxu1 }
 0x52b   :  { %2070 = vrot.lane.b32.xlu0 %v2022_v8, %s2837_s21 }
 0x52c   :  { %v1734_v63 = vpop.f32.mrf.mxu1 }
 0x53b   :  { %v1661_v19 = vpop.f32.mrf.mxu0 }
 0x53c   :  { %v1662_v57 = vadd.f32 %v1661_v19, %v1283_v27  ;;  %v2202_v27 = vld [vmem:[%s3620_s10 + $0x18] sm:$0xff] }
 0x53d   :  { %v1663_v58 = vpop.f32.mrf.mxu0  ;;  %2515 = vmatpush3.msra.mxu1 %v2202_v27  ;;  %v2391_v27 = vld [vmem:[#allocation18] ss:$0 sm:$0xff] }
 0x53e   :  { %v1733_v61 = vadd.f32 %v1732_v47, %v1662_v57  ;;  %v1664_v62 = vadd.f32 %v1663_v58, %v1287_v48  ;;  %2516 = vmatprep.subr.mxu1 %v2834_v0 }
 0x540   :  { %v3513_v15 = vmax.f32 %v1733_v61, 0.0  ;;  %v1735_v2 = vadd.f32 %v1734_v63, %v1664_v62  ;;  %v2201_v63 = vld [vmem:[%s3620_s10 + $0x10] sm:$0xff] }
 0x541   :  { %2517 = vmatpush3.msra.mxu1 %v2201_v63 }
 0x542   :  { %2081 = vrot.lane.b32.xlu0 %v3513_v15, %s2838_s4  ;;  %2077 = vrot.lane.b32.xlu1 %v3513_v15, %s2837_s21  ;;  %v3519_v44 = vmax.f32 %v1735_v2, 0.0  ;;  %v2200_v2 = vld [vmem:[%s3620_s10 + $0x8] sm:$0xff] }
 0x543   :  { %2518 = vmatprep.subr.mxu1 %v2834_v0 }
 0x544   :  { %2519 = vmatpush3.msra.mxu1 %v2200_v2 }
 0x545   :  { %v1874_v25 = vpop.f32.mrf.mxu0  ;;  %2520 = vmatprep.subr.mxu1 %v2834_v0 }
 0x546   :  { %2093 = vrot.lane.b32.xlu0 %v3519_v44, %s2836_s0 }
 0x547   :  { %v1876_v5 = vpop.f32.mrf.mxu0 }
 0x566   :  { %v2445_v14 = vpop.f32.mrf.mxu0 }
 0x568   :  { %v2446_v7 = vpop.f32.mrf.mxu0 }
 0x569   :  { %v2038_v24 = vpop.permute.xlu1 %2037  ;;  %v2447_v26 = vadd.f32 %v2446_v7, %v2445_v14  ;;  %v2199_v14 = vld [vmem:[%s3620_s10] sm:$0xff] }
 0x56a   :  { %v2040_v36 = vmax.f32 %v3492_v43, %v2038_v24  ;;  %2521 = vmatpush3.msra.mxu1 %v2199_v14 }
 0x56b   :  { %v1946_v10 = vadd.f32 %v2447_v26, %v2382_v28  ;;  %2525 = vmatprep.subr.mxu1 %v2834_v0 }
 0x56c   :  { %v1803_v20 = vpop.f32.mrf.mxu1  ;;  %v2044_v38 = vmax.f32 %v2040_v36, %v3528_v31 }
 0x56d   :  { %v1804_v22 = vadd.f32 %v1803_v20, %v1291_v17  ;;  %v2047_v49 = vpop.permute.xlu1 %2046 }
 0x56e   :  { %v1805_v23 = vpop.f32.mrf.mxu1  ;;  %v2049_v34 = vmax.f32 %v3492_v43, %v2047_v49 }
 0x56f   :  { %v1875_v60 = vadd.f32 %v1874_v25, %v1804_v22  ;;  %v1806_v6 = vadd.f32 %v1805_v23, %v1295_v18 }
 0x570   :  { %v2053_v37 = vmax.f32 %v2049_v34, %v3539_v35 }
 0x571   :  { %v2025_v29 = vmax.f32 %v1875_v60, 0.0  ;;  %v1877_v30 = vadd.f32 %v1876_v5, %v1806_v6  ;;  %v2584_v60 = vld [vmem:[#allocation13] ss:$0 sm:$0xff] }
 0x573   :  { %v3530_v32 = vmax.f32 %v1877_v30, 0.0  ;;  %2087 = vrot.lane.b32.xlu1 %v2025_v29, %s2838_s4 }
 0x574   :  { %v2015_v45 = vpop.f32.mrf.mxu1 }
 0x575   :  { %v2016_v33 = vadd.f32 %v2015_v45, %v1946_v10  ;;  %2105 = vrot.lane.b32.xlu0 %v3530_v32, %s2837_s21  ;;  %v2114_v22 = vmax.f32 %v3530_v32, %v3524_v16 }
 0x576   :  { %v2513_v4 = vpop.f32.mrf.mxu1 }
 0x577   :  { %v3536_v3 = vmax.f32 %v2016_v33, 0.0  ;;  %2098 = vrot.lane.b32.xlu1 %v2025_v29, %s2837_s21 }
 0x579   :  { %2116 = vrot.lane.b32.xlu0 %v3536_v3, %s2836_s0  ;;  %v2123_v24 = vmax.f32 %v3536_v3, %v3539_v35 }
 0x57b   :  { %2109 = vrot.lane.b32.xlu1 %v3530_v32, %s2838_s4 }
 0x57d   :  { %2130 = vrot.lane.b32.xlu0 %v2053_v37, %s2837_s21 }
 0x57f   :  { %2125 = vrot.lane.b32.xlu1 %v2044_v38, %s2836_s0 }
 0x583   :  { %2135 = vrot.lane.b32.xlu1 %v2054_v21, %s2836_s0 }
 0x599   :  { %v2066_v39 = vpop.permute.xlu0 %2065 }
 0x59a   :  { %v2068_v40 = vmax.f32 %v3496_v46, %v2066_v39  ;;  %v2074_v51 = vmax.f32 %v3503_v55, %v2066_v39 }
 0x59b   :  { %v2057_v41 = vpop.permute.xlu1 %2056 }
 0x59c   :  { %v2059_v42 = vmax.f32 %v3496_v46, %v2057_v41  ;;  %v2069_v12 = vmax.f32 %v2068_v40, %v2057_v41  ;;  %v2075_v52 = vmax.f32 %v2074_v51, %v2057_v41 }
 0x59d   :  { %v2071_v11 = vpop.permute.xlu0 %2070 }
 0x59e   :  { %v2073_v13 = vmax.f32 %v2069_v12, %v2071_v11  ;;  %v2063_v50 = vmax.f32 %v2059_v42, %v3524_v16 }
 0x5a0   :  { %2145 = vrot.lane.b32.xlu1 %v2073_v13, %s2837_s21  ;;  %2140 = vrot.lane.b32.xlu0 %v2063_v50, %s2838_s4 }
 0x5b4   :  { %v2082_v53 = vpop.permute.xlu0 %2081  ;;  %v2078_v54 = vpop.permute.xlu1 %2077 }
 0x5b5   :  { %v2084_v59 = vmax.f32 %v3503_v55, %v2082_v53  ;;  %v2080_v1 = vmax.f32 %v2075_v52, %v2078_v54  ;;  %v2285_v53 = vld [vmem:[#allocation16 + $0x8] sm:$0xff]  ;;  %v2284_v54 = vld [vmem:[#allocation16] sm:$0xff] }
 0x5b7   :  { %v2085_v56 = vmax.f32 %v2084_v59, %v3539_v35  ;;  %2150 = vrot.lane.b32.xlu0 %v2080_v1, %s2836_s0  ;;  %v2389_v59 = vld [vmem:[#allocation15] ss:$0 sm:$0xff] }
 0x5b8   :  { %v2094_v46 = vpop.permute.xlu0 %2093 }
 0x5b9   :  { %2155 = vrot.lane.b32.xlu1 %v2085_v56, %s2837_s21  ;;  %v2096_v48 = vmax.f32 %v3513_v15, %v2094_v46  ;;  %v2102_v47 = vmax.f32 %v3519_v44, %v2094_v46 }
 0x5e5   :  { %v2088_v8 = vpop.permute.xlu1 %2087 }
 0x5e6   :  { %v2090_v19 = vmax.f32 %v3513_v15, %v2088_v8  ;;  %v2103_v57 = vmax.f32 %v2102_v47, %v2088_v8  ;;  %v2097_v58 = vmax.f32 %v2096_v48, %v2088_v8 }
 0x5e7   :  { %v2106_v55 = vpop.permute.xlu0 %2105 }
 0x5e8   :  { %v2091_v61 = vmax.f32 %v2090_v19, %v3524_v16  ;;  %v2108_v15 = vmax.f32 %v2103_v57, %v2106_v55  ;;  %v2035_v16 = vmax.f32 %v3492_v43, %v2584_v60 }
 0x5e9   :  { %v2099_v62 = vpop.permute.xlu1 %2098 }
 0x5ea   :  { %v2101_v25 = vmax.f32 %v2097_v58, %v2099_v62  ;;  %2160 = vrot.lane.b32.xlu0 %v2091_v61, %s2838_s4 }
 0x5eb   :  { %v2117_v5 = vpop.permute.xlu0 %2116 }
 0x5ec   :  { %2165 = vrot.lane.b32.xlu1 %v2101_v25, %s2837_s21  ;;  %v2119_v18 = vmax.f32 %v3530_v32, %v2117_v5  ;;  %v2121_v7 = vmax.f32 %v3536_v3, %v2117_v5 }
 0x5ed   :  { %v2110_v9 = vpop.permute.xlu1 %2109 }
 0x5ee   :  { %v2112_v17 = vmax.f32 %v3519_v44, %v2110_v9  ;;  %2170 = vrot.lane.b32.xlu0 %v2108_v15, %s2836_s0  ;;  %v2120_v44 = vmax.f32 %v2119_v18, %v3539_v35  ;;  %v2122_v23 = vmax.f32 %v2121_v7, %v3528_v31 }
 0x5ef   :  { %v2131_v28 = vpop.permute.xlu0 %2130 }
 0x5f0   :  { %v2113_v20 = vmax.f32 %v2112_v17, %v3539_v35 }
 0x5f1   :  { %v2126_v26 = vpop.permute.xlu1 %2125 }
 0x5f2   :  { %2180 = vrot.lane.b32.xlu0 %v2114_v22, %s2838_s4  ;;  %2175 = vrot.lane.b32.xlu1 %v2113_v20, %s2837_s21  ;;  %v2128_v6 = vadd.f32 %v2126_v26, %v2035_v16 }
 0x5f4   :  { %v2133_v29 = vadd.f32 %v2131_v28, %v2128_v6 }
 0x5f5   :  { %v2136_v30 = vpop.permute.xlu1 %2135 }
 0x5f6   :  { %2190 = vrot.lane.b32.xlu0 %v2122_v23, %s2836_s0  ;;  %2185 = vrot.lane.b32.xlu1 %v2120_v44, %s2837_s21  ;;  %v2138_v10 = vadd.f32 %v2136_v30, %v2133_v29 }
 0x5fa   :  { %2195 = vrot.lane.b32.xlu1 %v2123_v24, %s2837_s21 }
 0x612   :  { %v2141_v32 = vpop.permute.xlu0 %2140  ;;  %v2146_v49 = vpop.permute.xlu1 %2145 }
 0x613   :  { %v2143_v31 = vadd.f32 %v2141_v32, %v2138_v10 }
 0x615   :  { %v2148_v33 = vadd.f32 %v2146_v49, %v2143_v31 }
 0x629   :  { %v2151_v45 = vpop.permute.xlu0 %2150 }
 0x62a   :  { %v2153_v4 = vadd.f32 %v2151_v45, %v2148_v33 }
 0x62b   :  { %v2156_v34 = vpop.permute.xlu1 %2155 }
 0x62c   :  { %v2158_v36 = vadd.f32 %v2156_v34, %v2153_v4 }
 0x65c   :  { %v2161_v3 = vpop.permute.xlu0 %2160 }
 0x65d   :  { %v2163_v35 = vadd.f32 %v2161_v3, %v2158_v36 }
 0x65e   :  { %v2166_v37 = vpop.permute.xlu1 %2165 }
 0x65f   :  { %v2168_v38 = vadd.f32 %v2166_v37, %v2163_v35 }
 0x660   :  { %v2171_v21 = vpop.permute.xlu0 %2170 }
 0x661   :  { %v2173_v39 = vadd.f32 %v2171_v21, %v2168_v38 }
 0x664   :  { %v2181_v43 = vpop.permute.xlu0 %2180  ;;  %v2176_v40 = vpop.permute.xlu1 %2175 }
 0x665   :  { %v2178_v41 = vadd.f32 %v2176_v40, %v2173_v39 }
 0x667   :  { %v2183_v42 = vadd.f32 %v2181_v43, %v2178_v41 }
 0x668   :  { %v2186_v12 = vpop.permute.xlu1 %2185  ;;  %v2191_v13 = vpop.permute.xlu0 %2190 }
 0x669   :  { %v2188_v11 = vadd.f32 %v2186_v12, %v2183_v42 }
 0x66b   :  { %v2193_v50 = vadd.f32 %v2191_v13, %v2188_v11 }
 0x66c   :  { %v2196_v51 = vpop.permute.xlu1 %2195 }
 0x66d   :  { %v2198_v52 = vadd.f32 %v2196_v51, %v2193_v50 }
 0x66f   :  { %2523 = vmatmul.mubr.msk.f32.vlgmr.msra.gmra.mxu1 %vm392_vm2, %v2198_v52 }
 0x670   :  { %2529 = vmatprep.mubr.msk.f32.mxu1 %vm2835_vm1, %v2834_v0  ;;  %2526 = vmatpush3.msra.mxu1 %v2285_v53 }
 0x671   :  { %2527 = vmatprep.subr.mxu1 %v2834_v0 }
 0x672   :  { %2528 = vmatpush3.msra.mxu1 %v2284_v54 }
 0x72f   :  { %v2279_v1 = vpop.f32.mrf.mxu1 }
 0x730   :  { %v2280_v56 = vadd.f32 %v2389_v59, %v2279_v1 }
 0x731   :  { %v2524_v46 = vpop.f32.mrf.mxu1 }
 0x732   :  { %v2283_v8 = vmax.f32 %v2280_v56, 0.0 }
 0x734   :  { %2530 = vmatmul.mubr.msk.f32.vlgmr.msra.gmra.mxu1 %vm204_vm0, %v2283_v8 }
 0x7f4   :  { %v2362_v48 = vpop.f32.mrf.mxu1 }
 0x7f5   :  { %v2363_v47 = vadd.f32 %v2391_v27, %v2362_v48 }
 0x7f6   :  { %v2531_v19 = vpop.f32.mrf.mxu1 }
 0x7f7   :  { %2367 = vst.msk [vmem:[%s3624_s14] sm:$0xff] %vm2366_vm5, %v2363_v47 }
 0x7f8   :  { %2372 = vsyncpa [#allocation3], 1 }
 0x7f9   :  { %2373 = vsyncpa [#allocation5], 1 }
 0x7fa   :  { %2374 = vsyncpa [#allocation8], 1 }
 0x7fb   :  { %2375 = vsyncpa [#allocation11], 1 }
 0x7fc   :  { %2376 = vsyncpa [#allocation14], 1 }
 0x7fd   :  { %2377 = vsyncpa [#allocation17], 1 }

</bundles_post_ra>
